<compile_context>
chip_gen: v6e
topology: v6e:2x2x1
jax: 0.10.0
libtpu: 0.0.40
codegen_flags: <defaults>
</compile_context>

<pallas_src>
import random

import jax
import jax.numpy as jnp
from jax.experimental import pallas as pl
from jax.experimental.pallas import tpu as pltpu


# -----------------------------------------------------------------------------
# Helpers
# -----------------------------------------------------------------------------
def _reorder_gates(w, hidden_size, axis=0):
    """PyTorch packs LSTM gates as (i, f, g, o); repack to (i, f, o, g)."""
    i, f, g, o = jnp.split(w, 4, axis=axis)
    return jnp.concatenate([i, f, o, g], axis=axis)


def _input_projection(seq, wih_t, bias):
    """Whole-sequence input projection (hoisted out of the recurrence).

    seq: (S, B, I) time-major; wih_t: (I, 4H); bias: (1, 4H) = b_ih + b_hh.
    Returns gates_x: (S, B, 4H) float32.
    """
    S, B, _ = seq.shape
    xin = seq.reshape(S * B, -1).astype(wih_t.dtype)
    g = jnp.dot(xin, wih_t, preferred_element_type=jnp.float32) + bias
    return g.reshape(S, B, -1)


def _vmem_spec():
    return pl.BlockSpec(memory_space=pltpu.MemorySpace.VMEM)


# -----------------------------------------------------------------------------
# Encoder kernel: one LSTM layer over the whole sequence, single invocation
# -----------------------------------------------------------------------------
def _lstm_seq_kernel(gx_ref, whh_ref, y_ref, h_ref, c_ref):
    """gx_ref : (S, B, 4H) f32  precomputed x_t @ W_ih^T + b (gate order i,f,o,g)
       whh_ref: (H, 4H)    bf16 recurrent weight (transposed)
       y_ref  : (S, B, H)  f32  per-step hidden states (layer output)
       h_ref/c_ref: (B, H) f32  final hidden / cell state
    """
    S = gx_ref.shape[0]
    B = gx_ref.shape[1]
    H = y_ref.shape[-1]

    def step(t, carry):
        h, c = carry
        g = gx_ref[t] + jnp.dot(h.astype(whh_ref.dtype), whh_ref[...],
                                preferred_element_type=jnp.float32)   # (B, 4H)
        s = jax.nn.sigmoid(g[:, :3 * H])          # i, f, o with one sigmoid
        i_g = s[:, 0:H]
        f_g = s[:, H:2 * H]
        o_g = s[:, 2 * H:3 * H]
        g_g = jnp.tanh(g[:, 3 * H:])
        c_new = f_g * c + i_g * g_g
        h_new = o_g * jnp.tanh(c_new)
        y_ref[t] = h_new                          # lane-dense (B, H) row
        return h_new, c_new

    zero = jnp.zeros((B, H), jnp.float32)
    h_n, c_n = jax.lax.fori_loop(0, S, step, (zero, zero),
                                 unroll=True if S <= 32 else 8)
    h_ref[...] = h_n
    c_ref[...] = c_n


@jax.jit
def _lstm_layer_forward(gates_x, whh_t):
    S, B, G = gates_x.shape
    H = G // 4
    return pl.pallas_call(
        _lstm_seq_kernel,
        out_shape=(jax.ShapeDtypeStruct((S, B, H), jnp.float32),
                   jax.ShapeDtypeStruct((B, H), jnp.float32),
                   jax.ShapeDtypeStruct((B, H), jnp.float32)),
        in_specs=[_vmem_spec(), _vmem_spec()],
        out_specs=(_vmem_spec(), _vmem_spec(), _vmem_spec()),
        compiler_params=pltpu.CompilerParams(
            vmem_limit_bytes=32 * 1024 * 1024),
    )(gates_x, whh_t)


# -----------------------------------------------------------------------------
# Decoder kernel: fused pointer attention + stacked LSTM cell (one decode step)
# -----------------------------------------------------------------------------
def _decoder_step_kernel(enc_out_ref, enc_proj_ref, w2_ref, v_ref, dec_in_ref,
                         h_in_ref, c_in_ref,
                         wih0h_ref, wih0x_ref, wih_ref, whh_ref, b_ref,
                         h_out_ref, c_out_ref, attw_ref):
    """enc_out_ref : (S, B, H)  time-major encoder output
       enc_proj_ref: (S, B, 2U) W1 @ encoder_out (hoisted, loop-invariant)
       w2_ref      : (H, 2U)    attention W2^T;  v_ref: (1, 2U) attention V
       dec_in_ref  : (B, 1)     scalar decoder input
       h_in/c_in   : (L, B, H)  previous hidden / cell state
       wih0h_ref   : (H, 4H) bf16 layer-0 input weight (context part)
       wih0x_ref   : (1, 4H) f32  layer-0 input weight (scalar-x part)
       wih_ref     : (max(L-1,1), H, 4H) bf16 input weights for layers >= 1
       whh_ref     : (L, H, 4H) bf16 recurrent weights
       b_ref       : (L, 1, 4H) f32 fused biases
       outputs: h_out/c_out (L, B, H), attw (S, B, 1) raw attention logits
    """
    S, B, H = enc_out_ref.shape
    L = h_in_ref.shape[0]
    f32 = jnp.float32
    bfp = whh_ref.dtype

    # ---- attention scores u_j = V tanh(W1 e_j + W2 h_0), vectorized over S ----
    ht = h_in_ref[0]                                                  # (B, H)
    proj_h = jnp.dot(ht, w2_ref[...], preferred_element_type=f32)     # (B, 2U)
    uj = jnp.tanh(enc_proj_ref[...] + proj_h[None, :, :])             # (S, B, 2U)
    scores = jnp.sum(uj * v_ref[...][None, :, :], axis=-1,
                     keepdims=True)                                   # (S, B, 1)
    attw_ref[...] = scores                                            # one store

    # ---- softmax over the sequence + attention context d_i ----
    m = jnp.max(scores, axis=0, keepdims=True)                        # (1, B, 1)
    e = jnp.exp(scores - m)                                           # (S, B, 1)
    inv = 1.0 / jnp.sum(e, axis=0, keepdims=True)                     # (1, B, 1)
    a = e * inv                                                       # (S, B, 1)
    di = jnp.sum(a * enc_out_ref[...], axis=0)                        # (B, H)

    # ---- stacked LSTM cell, one timestep, input = [d_i, dec_in] ----
    layer_in = di
    for layer in range(L):
        h_prev = h_in_ref[layer]
        c_prev = c_in_ref[layer]
        if layer == 0:
            gx = (jnp.dot(di.astype(bfp), wih0h_ref[...],
                          preferred_element_type=f32)
                  + dec_in_ref[...] * wih0x_ref[...])
        else:
            gx = jnp.dot(layer_in.astype(bfp), wih_ref[layer - 1],
                         preferred_element_type=f32)
        g = (gx
             + jnp.dot(h_prev.astype(bfp), whh_ref[layer],
                       preferred_element_type=f32)
             + b_ref[layer])
        s_act = jax.nn.sigmoid(g[:, :3 * H])
        i_g = s_act[:, 0:H]
        f_g = s_act[:, H:2 * H]
        o_g = s_act[:, 2 * H:3 * H]
        g_g = jnp.tanh(g[:, 3 * H:])
        c_new = f_g * c_prev + i_g * g_g
        h_new = o_g * jnp.tanh(c_new)
        h_out_ref[layer] = h_new
        c_out_ref[layer] = c_new
        layer_in = h_new


@jax.jit
def _decoder_step_call(enc_out_t, enc_proj_t, w2_t, v_row, dec_in, h, c,
                       wih0h, wih0x, wih_rest, whh_all, b_all):
    S, B, H = enc_out_t.shape
    L = h.shape[0]
    return pl.pallas_call(
        _decoder_step_kernel,
        out_shape=(jax.ShapeDtypeStruct((L, B, H), jnp.float32),
                   jax.ShapeDtypeStruct((L, B, H), jnp.float32),
                   jax.ShapeDtypeStruct((S, B, 1), jnp.float32)),
        in_specs=[_vmem_spec() for _ in range(12)],
        out_specs=(_vmem_spec(), _vmem_spec(), _vmem_spec()),
        compiler_params=pltpu.CompilerParams(
            vmem_limit_bytes=32 * 1024 * 1024),
    )(enc_out_t, enc_proj_t, w2_t, v_row, dec_in, h, c,
      wih0h, wih0x, wih_rest, whh_all, b_all)


# -----------------------------------------------------------------------------
# Modules
# -----------------------------------------------------------------------------
class Encoder:
    """nn.LSTM(1, hidden_size, num_layers, batch_first=True) on the Pallas kernel."""

    def __init__(self, hidden_size, num_layers, key):
        self.hidden_size = hidden_size
        self.num_layers = num_layers
        self.layers = []
        bound = 1.0 / float(hidden_size) ** 0.5
        for layer in range(num_layers):
            in_dim = 1 if layer == 0 else hidden_size
            key, k1, k2, k3, k4 = jax.random.split(key, 5)
            w_ih = jax.random.uniform(k1, (4 * hidden_size, in_dim),
                                      jnp.float32, -bound, bound)
            w_hh = jax.random.uniform(k2, (4 * hidden_size, hidden_size),
                                      jnp.float32, -bound, bound)
            b_ih = jax.random.uniform(k3, (4 * hidden_size,), jnp.float32, -bound, bound)
            b_hh = jax.random.uniform(k4, (4 * hidden_size,), jnp.float32, -bound, bound)
            w_ih = _reorder_gates(w_ih, hidden_size)
            w_hh = _reorder_gates(w_hh, hidden_size)
            bias = _reorder_gates(b_ih + b_hh, hidden_size)[None, :]
            wih_t = w_ih.T
            if layer > 0:
                wih_t = wih_t.astype(jnp.bfloat16)      # bf16 MXU operands
            whh_t = w_hh.T.astype(jnp.bfloat16)
            self.layers.append((wih_t, bias, whh_t))

    def __call__(self, x):
        """x: (B, S, 1) -> (output (B, S, H), (h_n, c_n) each (L, B, H))."""
        B, S, _ = x.shape
        seq = jnp.transpose(x, (1, 0, 2)).astype(jnp.float32)     # time-major
        h_list, c_list = [], []
        for (wih_t, bias, whh_t) in self.layers:
            gates_x = _input_projection(seq, wih_t, bias)         # hoisted matmul
            seq, h_n, c_n = _lstm_layer_forward(gates_x, whh_t)
            h_list.append(h_n)
            c_list.append(c_n)
        out = jnp.transpose(seq, (1, 0, 2))                       # (B, S, H)
        return out, (jnp.stack(h_list, 0), jnp.stack(c_list, 0))


class Decoder:
    """Attention + nn.LSTM(hidden_size + 1, hidden_size, num_layers) decoder step."""

    def __init__(self, hidden_size, attention_units=10, num_layers=1, *, key):
        self.hidden_size = hidden_size
        self.num_layers = num_layers
        H = hidden_size
        u2 = attention_units * 2
        key, ka1, ka2, ka3 = jax.random.split(key, 4)
        ab = 1.0 / float(H) ** 0.5
        self.w1_t = jax.random.uniform(ka1, (u2, H), jnp.float32, -ab, ab).T   # (H, 2U)
        self.w2_t = jax.random.uniform(ka2, (u2, H), jnp.float32, -ab, ab).T   # (H, 2U)
        vb = 1.0 / float(u2) ** 0.5
        self.v_row = jax.random.uniform(ka3, (1, u2), jnp.float32, -vb, vb)    # (1, 2U)

        bound = 1.0 / float(H) ** 0.5
        wih_list, whh_list, b_list = [], [], []
        for layer in range(num_layers):
            in_dim = H + 1 if layer == 0 else H
            key, k1, k2, k3, k4 = jax.random.split(key, 5)
            w_ih = jax.random.uniform(k1, (4 * H, in_dim), jnp.float32, -bound, bound)
            w_hh = jax.random.uniform(k2, (4 * H, H), jnp.float32, -bound, bound)
            b_ih = jax.random.uniform(k3, (4 * H,), jnp.float32, -bound, bound)
            b_hh = jax.random.uniform(k4, (4 * H,), jnp.float32, -bound, bound)
            w_ih = _reorder_gates(w_ih, H)
            w_hh = _reorder_gates(w_hh, H)
            bias = _reorder_gates(b_ih + b_hh, H)[None, :]
            if layer == 0:
                wih_t = w_ih.T                                     # (H + 1, 4H)
                self.wih0h = wih_t[:H, :].astype(jnp.bfloat16)
                self.wih0x = wih_t[H:, :]                          # (1, 4H) f32
            else:
                wih_list.append(w_ih.T.astype(jnp.bfloat16))
            whh_list.append(w_hh.T.astype(jnp.bfloat16))
            b_list.append(bias)
        self.whh_all = jnp.stack(whh_list, 0)                      # (L, H, 4H)
        self.b_all = jnp.stack(b_list, 0)                          # (L, 1, 4H)
        if num_layers > 1:
            self.wih_rest = jnp.stack(wih_list, 0)                 # (L-1, H, 4H)
        else:
            self.wih_rest = jnp.zeros((1, H, 4 * H), jnp.bfloat16)

    def step(self, dec_in, hidden, enc_out_t, enc_proj_t):
        """dec_in: (B, 1); hidden: (h, c) each (L, B, H); enc_* time-major."""
        h, c = hidden
        h_new, c_new, att_sb1 = _decoder_step_call(
            enc_out_t, enc_proj_t, self.w2_t, self.v_row, dec_in, h, c,
            self.wih0h, self.wih0x, self.wih_rest, self.whh_all, self.b_all)
        att_w = jnp.transpose(att_sb1[:, :, 0], (1, 0))            # (B, S)
        return (h_new, c_new), att_w

    def __call__(self, x, hidden, encoder_out):
        """Mirror of PyTorch Decoder.forward(x, hidden, encoder_out)."""
        enc_out_t = jnp.transpose(encoder_out, (1, 0, 2))
        enc_proj_t = jnp.einsum('sbh,hu->sbu', enc_out_t, self.w1_t)
        return self.step(x[:, 0, :], hidden, enc_out_t, enc_proj_t)


class PointerNetwork:
    def __init__(self, encoder, decoder):
        self.encoder = encoder
        self.decoder = decoder

    def __call__(self, x, y, teacher_force_ratio=0.5, seed=0):
        """x: (B, S) values, y: (B, S) int targets -> (outputs (S, B), batch_loss)."""
        rng = random.Random(seed)
        B, S = x.shape
        enc_in = x[..., None].astype(jnp.float32)
        out, hidden = self.encoder(enc_in)                         # (B, S, H)
        # hoisted out of the decode loop: time-major layout + W1 projection
        enc_out_t = jnp.transpose(out, (1, 0, 2))                  # (S, B, H)
        enc_proj_t = jnp.einsum('sbh,hu->sbu', enc_out_t, self.decoder.w1_t)

        batch_idx = jnp.arange(B)
        dec_in = jnp.zeros((B, 1), jnp.float32)
        loss = jnp.zeros((), jnp.float32)
        outputs = []
        for t in range(S):
            hidden, att_w = self.decoder.step(dec_in, hidden, enc_out_t, enc_proj_t)
            predictions = jnp.argmax(att_w, axis=1)
            teacher_force = rng.random() < teacher_force_ratio     # host-side
            idx = y[:, t] if teacher_force else predictions
            dec_in = x[batch_idx, idx].astype(jnp.float32)[:, None]
            # F.cross_entropy(att_w, y[:, t]) with mean reduction over the batch
            log_z = jax.nn.logsumexp(att_w, axis=1)
            loss = loss + jnp.mean(log_z - att_w[batch_idx, y[:, t]])
            outputs.append(predictions)
        outputs = jnp.stack(outputs, axis=0).astype(jnp.int32)     # (S, B)
        batch_loss = loss / B
        return outputs, batch_loss


# -----------------------------------------------------------------------------
# Pure-JAX references (numerical sanity checks)
# -----------------------------------------------------------------------------
def _encoder_reference(encoder, x):
    B, S, _ = x.shape
    H = encoder.hidden_size
    seq = jnp.transpose(x, (1, 0, 2)).astype(jnp.float32)
    h_ns, c_ns = [], []
    for (wih_t, bias, whh_t) in encoder.layers:
        gx = _input_projection(seq, wih_t, bias)

        def step(carry, g_x, whh_t=whh_t):
            h, c = carry
            g = g_x + jnp.dot(h.astype(whh_t.dtype), whh_t,
                              preferred_element_type=jnp.float32)
            s = jax.nn.sigmoid(g[:, :3 * H])
            i_g, f_g, o_g = s[:, :H], s[:, H:2 * H], s[:, 2 * H:3 * H]
            g_g = jnp.tanh(g[:, 3 * H:])
            c = f_g * c + i_g * g_g
            h = o_g * jnp.tanh(c)
            return (h, c), h

        init = (jnp.zeros((B, H), jnp.float32), jnp.zeros((B, H), jnp.float32))
        (h_n, c_n), ys = jax.lax.scan(step, init, gx)
        seq = ys
        h_ns.append(h_n)
        c_ns.append(c_n)
    return jnp.transpose(seq, (1, 0, 2)), (jnp.stack(h_ns, 0), jnp.stack(c_ns, 0))


def _decoder_reference_step(decoder, dec_in, hidden, encoder_out):
    h, c = hidden
    H = decoder.hidden_size
    ht = h[0]
    enc_proj = jnp.einsum('bsh,hu->bsu', encoder_out, decoder.w1_t)
    proj_h = jnp.dot(ht, decoder.w2_t)
    uj = jnp.tanh(enc_proj + proj_h[:, None, :])
    att_w = jnp.sum(uj * decoder.v_row[0][None, None, :], axis=-1)   # (B, S)
    aj = jax.nn.softmax(att_w, axis=1)
    di = jnp.sum(aj[:, :, None] * encoder_out, axis=1)               # (B, H)
    bfp = decoder.whh_all.dtype
    h_new, c_new = [], []
    layer_in = di
    for layer in range(decoder.num_layers):
        if layer == 0:
            gx = (jnp.dot(di.astype(bfp), decoder.wih0h,
                          preferred_element_type=jnp.float32)
                  + dec_in * decoder.wih0x)
        else:
            gx = jnp.dot(layer_in.astype(bfp), decoder.wih_rest[layer - 1],
                         preferred_element_type=jnp.float32)
        g = (gx + jnp.dot(h[layer].astype(bfp), decoder.whh_all[layer],
                          preferred_element_type=jnp.float32)
             + decoder.b_all[layer])
        s_act = jax.nn.sigmoid(g[:, :3 * H])
        i_g, f_g, o_g = s_act[:, :H], s_act[:, H:2 * H], s_act[:, 2 * H:3 * H]
        g_g = jnp.tanh(g[:, 3 * H:])
        cn = f_g * c[layer] + i_g * g_g
        hn = o_g * jnp.tanh(cn)
        h_new.append(hn)
        c_new.append(cn)
        layer_in = hn
    return jnp.stack(h_new, 0), jnp.stack(c_new, 0), att_w


# -----------------------------------------------------------------------------
if __name__ == "__main__":
    key = jax.random.PRNGKey(0)
    k_enc, k_dec, k_x = jax.random.split(key, 3)

    HIDDEN_SIZE = 128      # lane-aligned hidden size (multiple of 128)
    NUM_LAYERS = 2
    ATTN_UNITS = 10
    BATCH, SEQ = 2, 8

    encoder = Encoder(HIDDEN_SIZE, NUM_LAYERS, k_enc)
    decoder = Decoder(HIDDEN_SIZE, attention_units=ATTN_UNITS,
                      num_layers=NUM_LAYERS, key=k_dec)
    ptr_net = PointerNetwork(encoder, decoder)

    x = jax.random.randint(k_x, (BATCH, SEQ), 0, 100).astype(jnp.float32)
    y = jnp.argsort(x, axis=1).astype(jnp.int32)

    # --- encoder kernel vs pure-JAX reference ---
    enc_in = x[..., None]
    out, (h_n, c_n) = encoder(enc_in)
    jax.block_until_ready((out, h_n, c_n))
    ref_out, (ref_h, ref_c) = _encoder_reference(encoder, enc_in)
    assert out.shape == (BATCH, SEQ, HIDDEN_SIZE)
    assert h_n.shape == (NUM_LAYERS, BATCH, HIDDEN_SIZE)
    assert jnp.allclose(out, ref_out, atol=1e-2, rtol=1e-2), "encoder output mismatch"
    assert jnp.allclose(h_n, ref_h, atol=1e-2, rtol=1e-2), "encoder h_n mismatch"
    assert jnp.allclose(c_n, ref_c, atol=1e-2, rtol=1e-2), "encoder c_n mismatch"

    # --- decoder step kernel vs pure-JAX reference ---
    dec_in0 = jnp.zeros((BATCH, 1, 1), jnp.float32)
    (h1, c1), att_w = decoder(dec_in0, (h_n, c_n), out)
    jax.block_until_ready((h1, c1, att_w))
    rh, rc, ratt = _decoder_reference_step(decoder, dec_in0[:, 0, :], (h_n, c_n), out)
    assert att_w.shape == (BATCH, SEQ)
    assert jnp.allclose(att_w, ratt, atol=1e-2, rtol=1e-2), "attention logits mismatch"
    assert jnp.allclose(h1, rh, atol=1e-2, rtol=1e-2), "decoder h mismatch"
    assert jnp.allclose(c1, rc, atol=1e-2, rtol=1e-2), "decoder c mismatch"

    # --- full pointer-network forward (teacher forcing seeded, host-side) ---
    outputs, batch_loss = ptr_net(x, y, teacher_force_ratio=0.5, seed=0)
    jax.block_until_ready((outputs, batch_loss))
    assert outputs.shape == (SEQ, BATCH)
    assert bool(jnp.isfinite(batch_loss))

    print("KERNEL_OK")
</pallas_src>

<mosaic_0001>
module attributes {stable_mosaic.version = 11 : i64} {
  func.func @_lstm_seq_kernel(%arg0: memref<8x2x512xf32, #tpu.memory_space<vmem>>, %arg1: memref<128x512xbf16, #tpu.memory_space<vmem>>, %arg2: memref<8x2x128xf32, #tpu.memory_space<vmem>>, %arg3: memref<2x128xf32, #tpu.memory_space<vmem>>, %arg4: memref<2x128xf32, #tpu.memory_space<vmem>>) attributes {dimension_semantics = [], scalar_prefetch = 0 : i64, scratch_operands = 0 : i64, tpu.core_type = #tpu.core_type<tc>} {
    %cst = arith.constant 0.000000e+00 : f32
    %0 = vector.broadcast %cst : f32 to vector<2x128xf32>
    %c0_i32 = arith.constant 0 : i32
    %1 = arith.index_cast %c0_i32 : i32 to index
    %c0 = arith.constant 0 : index
    %c0_0 = arith.constant 0 : index
    %2 = vector.load %arg0[%1, %c0, %c0_0] : memref<8x2x512xf32, #tpu.memory_space<vmem>>, vector<1x2x512xf32>
    %3 = vector.shape_cast %2 : vector<1x2x512xf32> to vector<2x512xf32>
    %4 = arith.truncf %0 : vector<2x128xf32> to vector<2x128xbf16>
    %c0_1 = arith.constant 0 : index
    %c0_2 = arith.constant 0 : index
    %5 = vector.load %arg1[%c0_1, %c0_2] : memref<128x512xbf16, #tpu.memory_space<vmem>>, vector<128x512xbf16>
    %cst_3 = arith.constant dense<0.000000e+00> : vector<2x512xf32>
    %6 = tpu.matmul %4, %5, %cst_3 {dimension_numbers = #tpu.dot_dimension_numbers<[1], [0], [0], [1], [0, 0, 1, 1], [], []>} : vector<2x128xbf16>, vector<128x512xbf16>, vector<2x512xf32> -> vector<2x512xf32>
    %7 = arith.addf %3, %6 : vector<2x512xf32>
    %8 = vector.extract_strided_slice %7 {offsets = [0, 0], sizes = [2, 384], strides = [1, 1]} : vector<2x512xf32> to vector<2x384xf32>
    %9 = arith.negf %8 : vector<2x384xf32>
    %10 = math.exp %9 : vector<2x384xf32>
    %cst_4 = arith.constant 1.000000e+00 : f32
    %11 = vector.broadcast %cst_4 : f32 to vector<2x384xf32>
    %12 = arith.addf %11, %10 : vector<2x384xf32>
    %13 = arith.divf %11, %12 : vector<2x384xf32>
    %14 = vector.extract_strided_slice %13 {offsets = [0, 0], sizes = [2, 128], strides = [1, 1]} : vector<2x384xf32> to vector<2x128xf32>
    %15 = vector.extract_strided_slice %13 {offsets = [0, 128], sizes = [2, 128], strides = [1, 1]} : vector<2x384xf32> to vector<2x128xf32>
    %16 = vector.extract_strided_slice %13 {offsets = [0, 256], sizes = [2, 128], strides = [1, 1]} : vector<2x384xf32> to vector<2x128xf32>
    %17 = vector.extract_strided_slice %7 {offsets = [0, 384], sizes = [2, 128], strides = [1, 1]} : vector<2x512xf32> to vector<2x128xf32>
    %18 = math.tanh %17 : vector<2x128xf32>
    %19 = arith.mulf %15, %0 : vector<2x128xf32>
    %20 = arith.mulf %14, %18 : vector<2x128xf32>
    %21 = arith.addf %19, %20 : vector<2x128xf32>
    %22 = math.tanh %21 : vector<2x128xf32>
    %23 = arith.mulf %16, %22 : vector<2x128xf32>
    %24 = arith.index_cast %c0_i32 : i32 to index
    %c0_5 = arith.constant 0 : index
    %c0_6 = arith.constant 0 : index
    %25 = vector.load %arg2[%24, %c0_5, %c0_6] : memref<8x2x128xf32, #tpu.memory_space<vmem>>, vector<1x2x128xf32>
    %26 = vector.shape_cast %25 : vector<1x2x128xf32> to vector<2x128xf32>
    %27 = vector.shape_cast %23 : vector<2x128xf32> to vector<1x2x128xf32>
    tpu.vector_store %arg2[%24, %c0_5, %c0_6], %27 {strides = array<i32>} : memref<8x2x128xf32, #tpu.memory_space<vmem>>, vector<1x2x128xf32>,
    %c1_i32 = arith.constant 1 : i32
    %28 = arith.index_cast %c1_i32 : i32 to index
    %c0_7 = arith.constant 0 : index
    %c0_8 = arith.constant 0 : index
    %29 = vector.load %arg0[%28, %c0_7, %c0_8] : memref<8x2x512xf32, #tpu.memory_space<vmem>>, vector<1x2x512xf32>
    %30 = vector.shape_cast %29 : vector<1x2x512xf32> to vector<2x512xf32>
    %31 = arith.truncf %23 : vector<2x128xf32> to vector<2x128xbf16>
    %c0_9 = arith.constant 0 : index
    %c0_10 = arith.constant 0 : index
    %32 = vector.load %arg1[%c0_9, %c0_10] : memref<128x512xbf16, #tpu.memory_space<vmem>>, vector<128x512xbf16>
    %cst_11 = arith.constant dense<0.000000e+00> : vector<2x512xf32>
    %33 = tpu.matmul %31, %32, %cst_11 {dimension_numbers = #tpu.dot_dimension_numbers<[1], [0], [0], [1], [0, 0, 1, 1], [], []>} : vector<2x128xbf16>, vector<128x512xbf16>, vector<2x512xf32> -> vector<2x512xf32>
    %34 = arith.addf %30, %33 : vector<2x512xf32>
    %35 = vector.extract_strided_slice %34 {offsets = [0, 0], sizes = [2, 384], strides = [1, 1]} : vector<2x512xf32> to vector<2x384xf32>
    %36 = arith.negf %35 : vector<2x384xf32>
    %37 = math.exp %36 : vector<2x384xf32>
    %cst_12 = arith.constant 1.000000e+00 : f32
    %38 = vector.broadcast %cst_12 : f32 to vector<2x384xf32>
    %39 = arith.addf %38, %37 : vector<2x384xf32>
    %40 = arith.divf %38, %39 : vector<2x384xf32>
    %41 = vector.extract_strided_slice %40 {offsets = [0, 0], sizes = [2, 128], strides = [1, 1]} : vector<2x384xf32> to vector<2x128xf32>
    %42 = vector.extract_strided_slice %40 {offsets = [0, 128], sizes = [2, 128], strides = [1, 1]} : vector<2x384xf32> to vector<2x128xf32>
    %43 = vector.extract_strided_slice %40 {offsets = [0, 256], sizes = [2, 128], strides = [1, 1]} : vector<2x384xf32> to vector<2x128xf32>
    %44 = vector.extract_strided_slice %34 {offsets = [0, 384], sizes = [2, 128], strides = [1, 1]} : vector<2x512xf32> to vector<2x128xf32>
    %45 = math.tanh %44 : vector<2x128xf32>
    %46 = arith.mulf %42, %21 : vector<2x128xf32>
    %47 = arith.mulf %41, %45 : vector<2x128xf32>
    %48 = arith.addf %46, %47 : vector<2x128xf32>
    %49 = math.tanh %48 : vector<2x128xf32>
    %50 = arith.mulf %43, %49 : vector<2x128xf32>
    %51 = arith.index_cast %c1_i32 : i32 to index
    %c0_13 = arith.constant 0 : index
    %c0_14 = arith.constant 0 : index
    %52 = vector.load %arg2[%51, %c0_13, %c0_14] : memref<8x2x128xf32, #tpu.memory_space<vmem>>, vector<1x2x128xf32>
    %53 = vector.shape_cast %52 : vector<1x2x128xf32> to vector<2x128xf32>
    %54 = vector.shape_cast %50 : vector<2x128xf32> to vector<1x2x128xf32>
    tpu.vector_store %arg2[%51, %c0_13, %c0_14], %54 {strides = array<i32>} : memref<8x2x128xf32, #tpu.memory_space<vmem>>, vector<1x2x128xf32>,
    %c2_i32 = arith.constant 2 : i32
    %55 = arith.index_cast %c2_i32 : i32 to index
    %c0_15 = arith.constant 0 : index
    %c0_16 = arith.constant 0 : index
    %56 = vector.load %arg0[%55, %c0_15, %c0_16] : memref<8x2x512xf32, #tpu.memory_space<vmem>>, vector<1x2x512xf32>
    %57 = vector.shape_cast %56 : vector<1x2x512xf32> to vector<2x512xf32>
    %58 = arith.truncf %50 : vector<2x128xf32> to vector<2x128xbf16>
    %c0_17 = arith.constant 0 : index
    %c0_18 = arith.constant 0 : index
    %59 = vector.load %arg1[%c0_17, %c0_18] : memref<128x512xbf16, #tpu.memory_space<vmem>>, vector<128x512xbf16>
    %cst_19 = arith.constant dense<0.000000e+00> : vector<2x512xf32>
    %60 = tpu.matmul %58, %59, %cst_19 {dimension_numbers = #tpu.dot_dimension_numbers<[1], [0], [0], [1], [0, 0, 1, 1], [], []>} : vector<2x128xbf16>, vector<128x512xbf16>, vector<2x512xf32> -> vector<2x512xf32>
    %61 = arith.addf %57, %60 : vector<2x512xf32>
    %62 = vector.extract_strided_slice %61 {offsets = [0, 0], sizes = [2, 384], strides = [1, 1]} : vector<2x512xf32> to vector<2x384xf32>
    %63 = arith.negf %62 : vector<2x384xf32>
    %64 = math.exp %63 : vector<2x384xf32>
    %cst_20 = arith.constant 1.000000e+00 : f32
    %65 = vector.broadcast %cst_20 : f32 to vector<2x384xf32>
    %66 = arith.addf %65, %64 : vector<2x384xf32>
    %67 = arith.divf %65, %66 : vector<2x384xf32>
    %68 = vector.extract_strided_slice %67 {offsets = [0, 0], sizes = [2, 128], strides = [1, 1]} : vector<2x384xf32> to vector<2x128xf32>
    %69 = vector.extract_strided_slice %67 {offsets = [0, 128], sizes = [2, 128], strides = [1, 1]} : vector<2x384xf32> to vector<2x128xf32>
    %70 = vector.extract_strided_slice %67 {offsets = [0, 256], sizes = [2, 128], strides = [1, 1]} : vector<2x384xf32> to vector<2x128xf32>
    %71 = vector.extract_strided_slice %61 {offsets = [0, 384], sizes = [2, 128], strides = [1, 1]} : vector<2x512xf32> to vector<2x128xf32>
    %72 = math.tanh %71 : vector<2x128xf32>
    %73 = arith.mulf %69, %48 : vector<2x128xf32>
    %74 = arith.mulf %68, %72 : vector<2x128xf32>
    %75 = arith.addf %73, %74 : vector<2x128xf32>
    %76 = math.tanh %75 : vector<2x128xf32>
    %77 = arith.mulf %70, %76 : vector<2x128xf32>
    %78 = arith.index_cast %c2_i32 : i32 to index
    %c0_21 = arith.constant 0 : index
    %c0_22 = arith.constant 0 : index
    %79 = vector.load %arg2[%78, %c0_21, %c0_22] : memref<8x2x128xf32, #tpu.memory_space<vmem>>, vector<1x2x128xf32>
    %80 = vector.shape_cast %79 : vector<1x2x128xf32> to vector<2x128xf32>
    %81 = vector.shape_cast %77 : vector<2x128xf32> to vector<1x2x128xf32>
    tpu.vector_store %arg2[%78, %c0_21, %c0_22], %81 {strides = array<i32>} : memref<8x2x128xf32, #tpu.memory_space<vmem>>, vector<1x2x128xf32>,
    %c3_i32 = arith.constant 3 : i32
    %82 = arith.index_cast %c3_i32 : i32 to index
    %c0_23 = arith.constant 0 : index
    %c0_24 = arith.constant 0 : index
    %83 = vector.load %arg0[%82, %c0_23, %c0_24] : memref<8x2x512xf32, #tpu.memory_space<vmem>>, vector<1x2x512xf32>
    %84 = vector.shape_cast %83 : vector<1x2x512xf32> to vector<2x512xf32>
    %85 = arith.truncf %77 : vector<2x128xf32> to vector<2x128xbf16>
    %c0_25 = arith.constant 0 : index
    %c0_26 = arith.constant 0 : index
    %86 = vector.load %arg1[%c0_25, %c0_26] : memref<128x512xbf16, #tpu.memory_space<vmem>>, vector<128x512xbf16>
    %cst_27 = arith.constant dense<0.000000e+00> : vector<2x512xf32>
    %87 = tpu.matmul %85, %86, %cst_27 {dimension_numbers = #tpu.dot_dimension_numbers<[1], [0], [0], [1], [0, 0, 1, 1], [], []>} : vector<2x128xbf16>, vector<128x512xbf16>, vector<2x512xf32> -> vector<2x512xf32>
    %88 = arith.addf %84, %87 : vector<2x512xf32>
    %89 = vector.extract_strided_slice %88 {offsets = [0, 0], sizes = [2, 384], strides = [1, 1]} : vector<2x512xf32> to vector<2x384xf32>
    %90 = arith.negf %89 : vector<2x384xf32>
    %91 = math.exp %90 : vector<2x384xf32>
    %cst_28 = arith.constant 1.000000e+00 : f32
    %92 = vector.broadcast %cst_28 : f32 to vector<2x384xf32>
    %93 = arith.addf %92, %91 : vector<2x384xf32>
    %94 = arith.divf %92, %93 : vector<2x384xf32>
    %95 = vector.extract_strided_slice %94 {offsets = [0, 0], sizes = [2, 128], strides = [1, 1]} : vector<2x384xf32> to vector<2x128xf32>
    %96 = vector.extract_strided_slice %94 {offsets = [0, 128], sizes = [2, 128], strides = [1, 1]} : vector<2x384xf32> to vector<2x128xf32>
    %97 = vector.extract_strided_slice %94 {offsets = [0, 256], sizes = [2, 128], strides = [1, 1]} : vector<2x384xf32> to vector<2x128xf32>
    %98 = vector.extract_strided_slice %88 {offsets = [0, 384], sizes = [2, 128], strides = [1, 1]} : vector<2x512xf32> to vector<2x128xf32>
    %99 = math.tanh %98 : vector<2x128xf32>
    %100 = arith.mulf %96, %75 : vector<2x128xf32>
    %101 = arith.mulf %95, %99 : vector<2x128xf32>
    %102 = arith.addf %100, %101 : vector<2x128xf32>
    %103 = math.tanh %102 : vector<2x128xf32>
    %104 = arith.mulf %97, %103 : vector<2x128xf32>
    %105 = arith.index_cast %c3_i32 : i32 to index
    %c0_29 = arith.constant 0 : index
    %c0_30 = arith.constant 0 : index
    %106 = vector.load %arg2[%105, %c0_29, %c0_30] : memref<8x2x128xf32, #tpu.memory_space<vmem>>, vector<1x2x128xf32>
    %107 = vector.shape_cast %106 : vector<1x2x128xf32> to vector<2x128xf32>
    %108 = vector.shape_cast %104 : vector<2x128xf32> to vector<1x2x128xf32>
    tpu.vector_store %arg2[%105, %c0_29, %c0_30], %108 {strides = array<i32>} : memref<8x2x128xf32, #tpu.memory_space<vmem>>, vector<1x2x128xf32>,
    %c4_i32 = arith.constant 4 : i32
    %109 = arith.index_cast %c4_i32 : i32 to index
    %c0_31 = arith.constant 0 : index
    %c0_32 = arith.constant 0 : index
    %110 = vector.load %arg0[%109, %c0_31, %c0_32] : memref<8x2x512xf32, #tpu.memory_space<vmem>>, vector<1x2x512xf32>
    %111 = vector.shape_cast %110 : vector<1x2x512xf32> to vector<2x512xf32>
    %112 = arith.truncf %104 : vector<2x128xf32> to vector<2x128xbf16>
    %c0_33 = arith.constant 0 : index
    %c0_34 = arith.constant 0 : index
    %113 = vector.load %arg1[%c0_33, %c0_34] : memref<128x512xbf16, #tpu.memory_space<vmem>>, vector<128x512xbf16>
    %cst_35 = arith.constant dense<0.000000e+00> : vector<2x512xf32>
    %114 = tpu.matmul %112, %113, %cst_35 {dimension_numbers = #tpu.dot_dimension_numbers<[1], [0], [0], [1], [0, 0, 1, 1], [], []>} : vector<2x128xbf16>, vector<128x512xbf16>, vector<2x512xf32> -> vector<2x512xf32>
    %115 = arith.addf %111, %114 : vector<2x512xf32>
    %116 = vector.extract_strided_slice %115 {offsets = [0, 0], sizes = [2, 384], strides = [1, 1]} : vector<2x512xf32> to vector<2x384xf32>
    %117 = arith.negf %116 : vector<2x384xf32>
    %118 = math.exp %117 : vector<2x384xf32>
    %cst_36 = arith.constant 1.000000e+00 : f32
    %119 = vector.broadcast %cst_36 : f32 to vector<2x384xf32>
    %120 = arith.addf %119, %118 : vector<2x384xf32>
    %121 = arith.divf %119, %120 : vector<2x384xf32>
    %122 = vector.extract_strided_slice %121 {offsets = [0, 0], sizes = [2, 128], strides = [1, 1]} : vector<2x384xf32> to vector<2x128xf32>
    %123 = vector.extract_strided_slice %121 {offsets = [0, 128], sizes = [2, 128], strides = [1, 1]} : vector<2x384xf32> to vector<2x128xf32>
    %124 = vector.extract_strided_slice %121 {offsets = [0, 256], sizes = [2, 128], strides = [1, 1]} : vector<2x384xf32> to vector<2x128xf32>
    %125 = vector.extract_strided_slice %115 {offsets = [0, 384], sizes = [2, 128], strides = [1, 1]} : vector<2x512xf32> to vector<2x128xf32>
    %126 = math.tanh %125 : vector<2x128xf32>
    %127 = arith.mulf %123, %102 : vector<2x128xf32>
    %128 = arith.mulf %122, %126 : vector<2x128xf32>
    %129 = arith.addf %127, %128 : vector<2x128xf32>
    %130 = math.tanh %129 : vector<2x128xf32>
    %131 = arith.mulf %124, %130 : vector<2x128xf32>
    %132 = arith.index_cast %c4_i32 : i32 to index
    %c0_37 = arith.constant 0 : index
    %c0_38 = arith.constant 0 : index
    %133 = vector.load %arg2[%132, %c0_37, %c0_38] : memref<8x2x128xf32, #tpu.memory_space<vmem>>, vector<1x2x128xf32>
    %134 = vector.shape_cast %133 : vector<1x2x128xf32> to vector<2x128xf32>
    %135 = vector.shape_cast %131 : vector<2x128xf32> to vector<1x2x128xf32>
    tpu.vector_store %arg2[%132, %c0_37, %c0_38], %135 {strides = array<i32>} : memref<8x2x128xf32, #tpu.memory_space<vmem>>, vector<1x2x128xf32>,
    %c5_i32 = arith.constant 5 : i32
    %136 = arith.index_cast %c5_i32 : i32 to index
    %c0_39 = arith.constant 0 : index
    %c0_40 = arith.constant 0 : index
    %137 = vector.load %arg0[%136, %c0_39, %c0_40] : memref<8x2x512xf32, #tpu.memory_space<vmem>>, vector<1x2x512xf32>
    %138 = vector.shape_cast %137 : vector<1x2x512xf32> to vector<2x512xf32>
    %139 = arith.truncf %131 : vector<2x128xf32> to vector<2x128xbf16>
    %c0_41 = arith.constant 0 : index
    %c0_42 = arith.constant 0 : index
    %140 = vector.load %arg1[%c0_41, %c0_42] : memref<128x512xbf16, #tpu.memory_space<vmem>>, vector<128x512xbf16>
    %cst_43 = arith.constant dense<0.000000e+00> : vector<2x512xf32>
    %141 = tpu.matmul %139, %140, %cst_43 {dimension_numbers = #tpu.dot_dimension_numbers<[1], [0], [0], [1], [0, 0, 1, 1], [], []>} : vector<2x128xbf16>, vector<128x512xbf16>, vector<2x512xf32> -> vector<2x512xf32>
    %142 = arith.addf %138, %141 : vector<2x512xf32>
    %143 = vector.extract_strided_slice %142 {offsets = [0, 0], sizes = [2, 384], strides = [1, 1]} : vector<2x512xf32> to vector<2x384xf32>
    %144 = arith.negf %143 : vector<2x384xf32>
    %145 = math.exp %144 : vector<2x384xf32>
    %cst_44 = arith.constant 1.000000e+00 : f32
    %146 = vector.broadcast %cst_44 : f32 to vector<2x384xf32>
    %147 = arith.addf %146, %145 : vector<2x384xf32>
    %148 = arith.divf %146, %147 : vector<2x384xf32>
    %149 = vector.extract_strided_slice %148 {offsets = [0, 0], sizes = [2, 128], strides = [1, 1]} : vector<2x384xf32> to vector<2x128xf32>
    %150 = vector.extract_strided_slice %148 {offsets = [0, 128], sizes = [2, 128], strides = [1, 1]} : vector<2x384xf32> to vector<2x128xf32>
    %151 = vector.extract_strided_slice %148 {offsets = [0, 256], sizes = [2, 128], strides = [1, 1]} : vector<2x384xf32> to vector<2x128xf32>
    %152 = vector.extract_strided_slice %142 {offsets = [0, 384], sizes = [2, 128], strides = [1, 1]} : vector<2x512xf32> to vector<2x128xf32>
    %153 = math.tanh %152 : vector<2x128xf32>
    %154 = arith.mulf %150, %129 : vector<2x128xf32>
    %155 = arith.mulf %149, %153 : vector<2x128xf32>
    %156 = arith.addf %154, %155 : vector<2x128xf32>
    %157 = math.tanh %156 : vector<2x128xf32>
    %158 = arith.mulf %151, %157 : vector<2x128xf32>
    %159 = arith.index_cast %c5_i32 : i32 to index
    %c0_45 = arith.constant 0 : index
    %c0_46 = arith.constant 0 : index
    %160 = vector.load %arg2[%159, %c0_45, %c0_46] : memref<8x2x128xf32, #tpu.memory_space<vmem>>, vector<1x2x128xf32>
    %161 = vector.shape_cast %160 : vector<1x2x128xf32> to vector<2x128xf32>
    %162 = vector.shape_cast %158 : vector<2x128xf32> to vector<1x2x128xf32>
    tpu.vector_store %arg2[%159, %c0_45, %c0_46], %162 {strides = array<i32>} : memref<8x2x128xf32, #tpu.memory_space<vmem>>, vector<1x2x128xf32>,
    %c6_i32 = arith.constant 6 : i32
    %163 = arith.index_cast %c6_i32 : i32 to index
    %c0_47 = arith.constant 0 : index
    %c0_48 = arith.constant 0 : index
    %164 = vector.load %arg0[%163, %c0_47, %c0_48] : memref<8x2x512xf32, #tpu.memory_space<vmem>>, vector<1x2x512xf32>
    %165 = vector.shape_cast %164 : vector<1x2x512xf32> to vector<2x512xf32>
    %166 = arith.truncf %158 : vector<2x128xf32> to vector<2x128xbf16>
    %c0_49 = arith.constant 0 : index
    %c0_50 = arith.constant 0 : index
    %167 = vector.load %arg1[%c0_49, %c0_50] : memref<128x512xbf16, #tpu.memory_space<vmem>>, vector<128x512xbf16>
    %cst_51 = arith.constant dense<0.000000e+00> : vector<2x512xf32>
    %168 = tpu.matmul %166, %167, %cst_51 {dimension_numbers = #tpu.dot_dimension_numbers<[1], [0], [0], [1], [0, 0, 1, 1], [], []>} : vector<2x128xbf16>, vector<128x512xbf16>, vector<2x512xf32> -> vector<2x512xf32>
    %169 = arith.addf %165, %168 : vector<2x512xf32>
    %170 = vector.extract_strided_slice %169 {offsets = [0, 0], sizes = [2, 384], strides = [1, 1]} : vector<2x512xf32> to vector<2x384xf32>
    %171 = arith.negf %170 : vector<2x384xf32>
    %172 = math.exp %171 : vector<2x384xf32>
    %cst_52 = arith.constant 1.000000e+00 : f32
    %173 = vector.broadcast %cst_52 : f32 to vector<2x384xf32>
    %174 = arith.addf %173, %172 : vector<2x384xf32>
    %175 = arith.divf %173, %174 : vector<2x384xf32>
    %176 = vector.extract_strided_slice %175 {offsets = [0, 0], sizes = [2, 128], strides = [1, 1]} : vector<2x384xf32> to vector<2x128xf32>
    %177 = vector.extract_strided_slice %175 {offsets = [0, 128], sizes = [2, 128], strides = [1, 1]} : vector<2x384xf32> to vector<2x128xf32>
    %178 = vector.extract_strided_slice %175 {offsets = [0, 256], sizes = [2, 128], strides = [1, 1]} : vector<2x384xf32> to vector<2x128xf32>
    %179 = vector.extract_strided_slice %169 {offsets = [0, 384], sizes = [2, 128], strides = [1, 1]} : vector<2x512xf32> to vector<2x128xf32>
    %180 = math.tanh %179 : vector<2x128xf32>
    %181 = arith.mulf %177, %156 : vector<2x128xf32>
    %182 = arith.mulf %176, %180 : vector<2x128xf32>
    %183 = arith.addf %181, %182 : vector<2x128xf32>
    %184 = math.tanh %183 : vector<2x128xf32>
    %185 = arith.mulf %178, %184 : vector<2x128xf32>
    %186 = arith.index_cast %c6_i32 : i32 to index
    %c0_53 = arith.constant 0 : index
    %c0_54 = arith.constant 0 : index
    %187 = vector.load %arg2[%186, %c0_53, %c0_54] : memref<8x2x128xf32, #tpu.memory_space<vmem>>, vector<1x2x128xf32>
    %188 = vector.shape_cast %187 : vector<1x2x128xf32> to vector<2x128xf32>
    %189 = vector.shape_cast %185 : vector<2x128xf32> to vector<1x2x128xf32>
    tpu.vector_store %arg2[%186, %c0_53, %c0_54], %189 {strides = array<i32>} : memref<8x2x128xf32, #tpu.memory_space<vmem>>, vector<1x2x128xf32>,
    %c7_i32 = arith.constant 7 : i32
    %190 = arith.index_cast %c7_i32 : i32 to index
    %c0_55 = arith.constant 0 : index
    %c0_56 = arith.constant 0 : index
    %191 = vector.load %arg0[%190, %c0_55, %c0_56] : memref<8x2x512xf32, #tpu.memory_space<vmem>>, vector<1x2x512xf32>
    %192 = vector.shape_cast %191 : vector<1x2x512xf32> to vector<2x512xf32>
    %193 = arith.truncf %185 : vector<2x128xf32> to vector<2x128xbf16>
    %c0_57 = arith.constant 0 : index
    %c0_58 = arith.constant 0 : index
    %194 = vector.load %arg1[%c0_57, %c0_58] : memref<128x512xbf16, #tpu.memory_space<vmem>>, vector<128x512xbf16>
    %cst_59 = arith.constant dense<0.000000e+00> : vector<2x512xf32>
    %195 = tpu.matmul %193, %194, %cst_59 {dimension_numbers = #tpu.dot_dimension_numbers<[1], [0], [0], [1], [0, 0, 1, 1], [], []>} : vector<2x128xbf16>, vector<128x512xbf16>, vector<2x512xf32> -> vector<2x512xf32>
    %196 = arith.addf %192, %195 : vector<2x512xf32>
    %197 = vector.extract_strided_slice %196 {offsets = [0, 0], sizes = [2, 384], strides = [1, 1]} : vector<2x512xf32> to vector<2x384xf32>
    %198 = arith.negf %197 : vector<2x384xf32>
    %199 = math.exp %198 : vector<2x384xf32>
    %cst_60 = arith.constant 1.000000e+00 : f32
    %200 = vector.broadcast %cst_60 : f32 to vector<2x384xf32>
    %201 = arith.addf %200, %199 : vector<2x384xf32>
    %202 = arith.divf %200, %201 : vector<2x384xf32>
    %203 = vector.extract_strided_slice %202 {offsets = [0, 0], sizes = [2, 128], strides = [1, 1]} : vector<2x384xf32> to vector<2x128xf32>
    %204 = vector.extract_strided_slice %202 {offsets = [0, 128], sizes = [2, 128], strides = [1, 1]} : vector<2x384xf32> to vector<2x128xf32>
    %205 = vector.extract_strided_slice %202 {offsets = [0, 256], sizes = [2, 128], strides = [1, 1]} : vector<2x384xf32> to vector<2x128xf32>
    %206 = vector.extract_strided_slice %196 {offsets = [0, 384], sizes = [2, 128], strides = [1, 1]} : vector<2x512xf32> to vector<2x128xf32>
    %207 = math.tanh %206 : vector<2x128xf32>
    %208 = arith.mulf %204, %183 : vector<2x128xf32>
    %209 = arith.mulf %203, %207 : vector<2x128xf32>
    %210 = arith.addf %208, %209 : vector<2x128xf32>
    %211 = math.tanh %210 : vector<2x128xf32>
    %212 = arith.mulf %205, %211 : vector<2x128xf32>
    %213 = arith.index_cast %c7_i32 : i32 to index
    %c0_61 = arith.constant 0 : index
    %c0_62 = arith.constant 0 : index
    %214 = vector.load %arg2[%213, %c0_61, %c0_62] : memref<8x2x128xf32, #tpu.memory_space<vmem>>, vector<1x2x128xf32>
    %215 = vector.shape_cast %214 : vector<1x2x128xf32> to vector<2x128xf32>
    %216 = vector.shape_cast %212 : vector<2x128xf32> to vector<1x2x128xf32>
    tpu.vector_store %arg2[%213, %c0_61, %c0_62], %216 {strides = array<i32>} : memref<8x2x128xf32, #tpu.memory_space<vmem>>, vector<1x2x128xf32>,
    %c8_i32 = arith.constant 8 : i32
    %c0_63 = arith.constant 0 : index
    %c0_64 = arith.constant 0 : index
    %217 = vector.load %arg3[%c0_63, %c0_64] : memref<2x128xf32, #tpu.memory_space<vmem>>, vector<2x128xf32>
    tpu.vector_store %arg3[%c0_63, %c0_64], %212 {strides = array<i32>} : memref<2x128xf32, #tpu.memory_space<vmem>>, vector<2x128xf32>,
    %c0_65 = arith.constant 0 : index
    %c0_66 = arith.constant 0 : index
    %218 = vector.load %arg4[%c0_65, %c0_66] : memref<2x128xf32, #tpu.memory_space<vmem>>, vector<2x128xf32>
    tpu.vector_store %arg4[%c0_65, %c0_66], %210 {strides = array<i32>} : memref<2x128xf32, #tpu.memory_space<vmem>>, vector<2x128xf32>,
    return
  }
}

</mosaic_0001>

<bundles_post_ra>
// kernel: _lstm_layer_forward.1
= control target key start
LH: loop header
LB: loop body
LE: loop exit
PB: predicated region body
PF: predicated region fallthrough
CT: control target
= control target key end

     0   :  { %10 = vsyncpa [#allocation3], 0  ;;  %s3707_s0 = inlined_call_operand.hbm [shape: f32[8,2,512], index: 0, kind: input, shape index: {}]   ;;  %s3708_s1 = inlined_call_operand.hbm [shape: bf16[128,512], index: 1, kind: input, shape index: {}]   ;;  %s3709_s2 = inlined_call_operand.hbm [shape: f32[8,2,128], index: 2, kind: output, shape index: {0}]   ;;  %s3710_s3 = inlined_call_operand.hbm [shape: f32[2,128], index: 3, kind: output, shape index: {1}]   ;;  %s3711_s4 = inlined_call_operand.hbm [shape: f32[2,128], index: 4, kind: output, shape index: {2}]  }
   0x1   :  { %11 = vsyncpa [#allocation6], 0 }
   0x2   :  { %12 = vsyncpa [#allocation4], 0 }
   0x3   :  { %13 = vsyncpa [#allocation9], 0  ;;  %s3210_s15 = smov [#allocation2]  }
   0x4   :  { %s19_s16 = sshll.u32 %s3210_s15, 4  ;;  %s20_s16 = int_to_ptr.vmem [resolvable:$true] %s19_s16 }
   0x5   :  { %s3110_s17 = scalar_lea.vmem %s20_s16, 1024  ;;  %p3115_p1 = scmp.lt.s32.totalorder %s20_s16, %s20_s16 }
   0x6   :  { %p3111_p0 = scmp.ne.s32.totalorder %s20_s16, %s3110_s17  ;;  %p3116_p2 = scmp.lt.s32.totalorder %s3110_s17, %s3110_s17 }
   0x8   :  { %p3117_p3 = por %p3116_p2, %p3115_p1 }
   0xa   :  { %p3118_p4 = pnand %p3117_p3, %p3111_p0 }
   0xc   :  { %3121 = shalt.err (!%p3118_p4)
}
   0xd   :  { %s3211_s18 = smov 128   ;;  %s3212_s19 = smov 8  }
   0xe   :  { %25 = dma.hbm_to_vmem [thread:$0]  %s3707_s0, 1024, %s20_s16, [#allocation3], %s3211_s18, %s3211_s18, %s3212_s19  }
   0xf   :  { %s3213_s22 = smov [#allocation5]  }
  0x10   :  { %s31_s23 = sshll.u32 %s3213_s22, 4  ;;  %s32_s23 = int_to_ptr.vmem [resolvable:$true] %s31_s23 }
  0x11   :  { %s3130_s24 = scalar_lea.vmem %s32_s23, 4096  ;;  %p3135_p6 = scmp.lt.s32.totalorder %s32_s23, %s32_s23 }
  0x12   :  { %p3131_p5 = scmp.ne.s32.totalorder %s32_s23, %s3130_s24  ;;  %p3136_p7 = scmp.lt.s32.totalorder %s3130_s24, %s3130_s24 }
  0x14   :  { %p3137_p8 = por %p3136_p7, %p3135_p6 }
  0x16   :  { %p3138_p9 = pnand %p3137_p8, %p3131_p5 }
  0x18   :  { %3141 = shalt.err (!%p3138_p9)
}
  0x19   :  { %s3214_s25 = smov 256   ;;  %s3215_s26 = smov 16  }
  0x1a   :  { %37 = dma.hbm_to_vmem [thread:$0]  %s3708_s1, 4096, %s32_s23, [#allocation6], %s3214_s25, %s3214_s25, %s3215_s26  }
  0x1b   :  { %3202 = dma.done.wait [#allocation3], 1024  }
  0x1c   :  { %3203 = vsyncadd [#allocation3], 4294966272 }
  0x1d   :  { %3204 = dma.done.wait [#allocation6], 4096  }
  0x1e   :  { %3205 = vsyncadd [#allocation6], 4294963200  ;;  %v3216_v0 = vmov 0   ;;  %v3256_v1 = vld [vmem:[#allocation5 + $0xe4] ss:$16 sps:$4 sm:$0xff]   ;;  %v329_v35 = vlaneseq  ;;  %s3218_s0 = smov [#allocation8]  }
  0x1f   :  { %270 = vmatprep.mubr.bf16.mxu0 %v3216_v0  ;;  %311 = vmatprep.mubr.bf16.mxu1 %v3216_v0  ;;  %v3258_v2 = vld [vmem:[#allocation5 + $0xec] ss:$16 sps:$4 sm:$0xff]   ;;  %v3261_v3 = vld [vmem:[#allocation5 + $0xe0] ss:$16 sps:$4 sm:$0xff]   ;;  %v3263_v4 = vld [vmem:[#allocation5 + $0xe8] ss:$16 sps:$4 sm:$0xff]  }
  0x20   :  { %238 = vmatprep.subr.bf16.mxu0 %v3256_v1  ;;  %279 = vmatprep.subr.bf16.mxu1 %v3258_v2  ;;  %v3266_v5 = vld [vmem:[#allocation5 + $0xc4] ss:$16 sps:$4 sm:$0xff]   ;;  %v3270_v6 = vld [vmem:[#allocation5 + $0xcc] ss:$16 sps:$4 sm:$0xff]   ;;  %v3272_v7 = vld [vmem:[#allocation5 + $0xc0] ss:$16 sps:$4 sm:$0xff]  }
  0x21   :  { %239 = vmatpush1.bf16.msra.mxu0 %v3261_v3  ;;  %280 = vmatpush1.bf16.msra.mxu1 %v3263_v4  ;;  %v3275_v8 = vld [vmem:[#allocation5 + $0xc8] ss:$16 sps:$4 sm:$0xff]   ;;  %v3278_v9 = vld [vmem:[#allocation5 + $0xa4] ss:$16 sps:$4 sm:$0xff]   ;;  %v3280_v10 = vld [vmem:[#allocation5 + $0xac] ss:$16 sps:$4 sm:$0xff]  }
  0x22   :  { %240 = vmatprep.subr.bf16.mxu0 %v3266_v5  ;;  %281 = vmatprep.subr.bf16.mxu1 %v3270_v6  ;;  %v3282_v11 = vld [vmem:[#allocation5 + $0xa0] ss:$16 sps:$4 sm:$0xff]   ;;  %v3284_v12 = vld [vmem:[#allocation5 + $0xa8] ss:$16 sps:$4 sm:$0xff]   ;;  %v3288_v13 = vld [vmem:[#allocation5 + $0x84] ss:$16 sps:$4 sm:$0xff]  }
  0x23   :  { %v3292_v14 = vld [vmem:[#allocation5 + $0x8c] ss:$16 sps:$4 sm:$0xff]   ;;  %v3294_v15 = vld [vmem:[#allocation5 + $0x80] ss:$16 sps:$4 sm:$0xff]   ;;  %v3298_v16 = vld [vmem:[#allocation5 + $0x88] ss:$16 sps:$4 sm:$0xff]  }
  0x24   :  { %v3300_v17 = vld [vmem:[#allocation5 + $0x64] ss:$16 sps:$4 sm:$0xff]   ;;  %v3304_v18 = vld [vmem:[#allocation5 + $0x6c] ss:$16 sps:$4 sm:$0xff]   ;;  %v3306_v19 = vld [vmem:[#allocation5 + $0x60] ss:$16 sps:$4 sm:$0xff]  }
  0x25   :  { %241 = vmatpush1.bf16.msra.mxu0 %v3272_v7  ;;  %282 = vmatpush1.bf16.msra.mxu1 %v3275_v8  ;;  %v3308_v20 = vld [vmem:[#allocation5 + $0x68] ss:$16 sps:$4 sm:$0xff]   ;;  %v3312_v21 = vld [vmem:[#allocation5 + $0x44] ss:$16 sps:$4 sm:$0xff]   ;;  %v3316_v22 = vld [vmem:[#allocation5 + $0x4c] ss:$16 sps:$4 sm:$0xff]  }
  0x26   :  { %242 = vmatprep.subr.bf16.mxu0 %v3278_v9  ;;  %283 = vmatprep.subr.bf16.mxu1 %v3280_v10  ;;  %v3318_v23 = vld [vmem:[#allocation5 + $0x40] ss:$16 sps:$4 sm:$0xff]   ;;  %v3322_v24 = vld [vmem:[#allocation5 + $0x48] ss:$16 sps:$4 sm:$0xff]   ;;  %v3324_v25 = vld [vmem:[#allocation5 + $0x24] ss:$16 sps:$4 sm:$0xff]  }
  0x27   :  { %v3328_v26 = vld [vmem:[#allocation5 + $0x2c] ss:$16 sps:$4 sm:$0xff]   ;;  %v3330_v27 = vld [vmem:[#allocation5 + $0x20] ss:$16 sps:$4 sm:$0xff]   ;;  %v3332_v28 = vld [vmem:[#allocation5 + $0x28] ss:$16 sps:$4 sm:$0xff]  }
  0x28   :  { %v3334_v29 = vld [vmem:[#allocation5 + $0x4] ss:$16 sps:$4 sm:$0xff]   ;;  %v3336_v30 = vld [vmem:[#allocation5 + $0xc] ss:$16 sps:$4 sm:$0xff]   ;;  %v3342_v31 = vld [vmem:[#allocation5] ss:$16 sps:$4 sm:$0xff]  }
  0x29   :  { %243 = vmatpush1.bf16.msra.mxu0 %v3282_v11  ;;  %284 = vmatpush1.bf16.msra.mxu1 %v3284_v12  ;;  %v3344_v32 = vld [vmem:[#allocation5 + $0x8] ss:$16 sps:$4 sm:$0xff]   ;;  %v3217_v33 = vmov 1983009808   ;;  %v330_v37 = vshrl.u32 %v329_v35, 7  ;;  %v45_v49 = vld [vmem:[#allocation2] sm:$0xff] }
  0x2a   :  { %244 = vmatprep.subr.bf16.mxu0 %v3288_v13  ;;  %285 = vmatprep.subr.bf16.mxu1 %v3292_v14  ;;  %v327_v34 = vunpack.c.l.s4 %v3217_v33  ;;  %s2638_s1 = sshll.u32 %s3218_s0, 4  ;;  %s3219_s29 = smov [#allocation7]   ;;  %s2639_s1 = int_to_ptr.vmem [resolvable:$true] %s2638_s1 }
  0x2b   :  { %s2625_s30 = sshll.u32 %s3219_s29, 4  ;;  %s3220_s5 = smov [#allocation10]   ;;  %s2626_s30 = int_to_ptr.vmem [resolvable:$true] %s2625_s30 }
  0x2c   :  { %v328_v36 = vunpack.c.0.s8 %v327_v34  ;;  %s2648_s6 = sshll.u32 %s3220_s5, 4  ;;  %s3142_s7 = scalar_lea.vmem %s2639_s1, 32  ;;  %s2649_s6 = int_to_ptr.vmem [resolvable:$true] %s2648_s6 }
  0x2d   :  { %245 = vmatpush1.bf16.msra.mxu0 %v3294_v15  ;;  %286 = vmatpush1.bf16.msra.mxu1 %v3298_v16  ;;  %p3143_p10 = scmp.ne.s32.totalorder %s2639_s1, %s3142_s7  ;;  %p3147_p11 = scmp.lt.s32.totalorder %s2639_s1, %s2639_s1 }
  0x2e   :  { %246 = vmatprep.subr.bf16.mxu0 %v3300_v17  ;;  %287 = vmatprep.subr.bf16.mxu1 %v3304_v18  ;;  %v3390_v40 = vsub.s32 %v328_v36, %v330_v37  ;;  %p3148_p12 = scmp.lt.s32.totalorder %s3142_s7, %s3142_s7 }
  0x30   :  { %p3149_p13 = por %p3148_p12, %p3147_p11 }
  0x31   :  { %247 = vmatpush1.bf16.msra.mxu0 %v3306_v19  ;;  %288 = vmatpush1.bf16.msra.mxu1 %v3308_v20 }
  0x32   :  { %248 = vmatprep.subr.bf16.mxu0 %v3312_v21  ;;  %289 = vmatprep.subr.bf16.mxu1 %v3316_v22  ;;  %p3150_p0 = pnand %p3149_p13, %p3143_p10 }
  0x35   :  { %249 = vmatpush1.bf16.msra.mxu0 %v3318_v23  ;;  %290 = vmatpush1.bf16.msra.mxu1 %v3322_v24 }
  0x36   :  { %250 = vmatprep.subr.bf16.mxu0 %v3324_v25  ;;  %291 = vmatprep.subr.bf16.mxu1 %v3328_v26 }
  0x39   :  { %251 = vmatpush1.bf16.msra.mxu0 %v3330_v27  ;;  %292 = vmatpush1.bf16.msra.mxu1 %v3332_v28 }
  0x3a   :  { %252 = vmatprep.subr.bf16.mxu0 %v3334_v29  ;;  %293 = vmatprep.subr.bf16.mxu1 %v3336_v30 }
  0x3d   :  { %253 = vmatpush1.bf16.msra.mxu0 %v3342_v31  ;;  %294 = vmatpush1.bf16.msra.mxu1 %v3344_v32 }
  0x3e   :  { %559 = vmatprep.subr.bf16.mxu0 %v3256_v1  ;;  %600 = vmatprep.subr.bf16.mxu1 %v3258_v2 }
  0x40   :  { %271 = vmatmul.mubr.bf16.vlgmr.msra.gmra.mxu0 %v3216_v0  ;;  %312 = vmatmul.mubr.bf16.vlgmr.msra.gmra.mxu1 %v3216_v0 }
  0x41   :  { %560 = vmatpush1.bf16.msra.mxu0 %v3261_v3  ;;  %601 = vmatpush1.bf16.msra.mxu1 %v3263_v4 }
  0x42   :  { %561 = vmatprep.subr.bf16.mxu0 %v3266_v5  ;;  %602 = vmatprep.subr.bf16.mxu1 %v3270_v6 }
  0x43   :  { %591 = vmatprep.mubr.bf16.mxu0 %v3216_v0  ;;  %632 = vmatprep.mubr.bf16.mxu1 %v3216_v0 }
  0x45   :  { %562 = vmatpush1.bf16.msra.mxu0 %v3272_v7  ;;  %603 = vmatpush1.bf16.msra.mxu1 %v3275_v8 }
  0x46   :  { %563 = vmatprep.subr.bf16.mxu0 %v3278_v9  ;;  %604 = vmatprep.subr.bf16.mxu1 %v3280_v10 }
  0x49   :  { %564 = vmatpush1.bf16.msra.mxu0 %v3282_v11  ;;  %605 = vmatpush1.bf16.msra.mxu1 %v3284_v12 }
  0x4a   :  { %565 = vmatprep.subr.bf16.mxu0 %v3288_v13  ;;  %606 = vmatprep.subr.bf16.mxu1 %v3292_v14 }
  0x4d   :  { %566 = vmatpush1.bf16.msra.mxu0 %v3294_v15  ;;  %607 = vmatpush1.bf16.msra.mxu1 %v3298_v16 }
  0x4e   :  { %567 = vmatprep.subr.bf16.mxu0 %v3300_v17  ;;  %608 = vmatprep.subr.bf16.mxu1 %v3304_v18 }
  0x51   :  { %568 = vmatpush1.bf16.msra.mxu0 %v3306_v19  ;;  %609 = vmatpush1.bf16.msra.mxu1 %v3308_v20 }
  0x52   :  { %569 = vmatprep.subr.bf16.mxu0 %v3312_v21  ;;  %610 = vmatprep.subr.bf16.mxu1 %v3316_v22 }
  0x55   :  { %570 = vmatpush1.bf16.msra.mxu0 %v3318_v23  ;;  %611 = vmatpush1.bf16.msra.mxu1 %v3322_v24 }
  0x56   :  { %571 = vmatprep.subr.bf16.mxu0 %v3324_v25  ;;  %612 = vmatprep.subr.bf16.mxu1 %v3328_v26 }
  0x59   :  { %572 = vmatpush1.bf16.msra.mxu0 %v3330_v27  ;;  %613 = vmatpush1.bf16.msra.mxu1 %v3332_v28 }
  0x5a   :  { %573 = vmatprep.subr.bf16.mxu0 %v3334_v29  ;;  %614 = vmatprep.subr.bf16.mxu1 %v3336_v30 }
  0x5d   :  { %574 = vmatpush1.bf16.msra.mxu0 %v3342_v31  ;;  %615 = vmatpush1.bf16.msra.mxu1 %v3344_v32 }
  0x5e   :  { %881 = vmatprep.subr.bf16.mxu0 %v3256_v1  ;;  %922 = vmatprep.subr.bf16.mxu1 %v3258_v2 }
 0x100   :  { %v272_v38 = vpop.f32.mrf.mxu0  ;;  %v313_v39 = vpop.f32.mrf.mxu1 }
 0x102   :  { %v274_v41 = vpop.f32.mrf.mxu0  ;;  %v315_v42 = vpop.f32.mrf.mxu1 }
 0x103   :  { %v324_v43 = vcombine.low %v272_v38, %v274_v41  ;;  %v325_v44 = vcombine.low %v313_v39, %v315_v42 }
 0x104   :  { %v276_v45 = vpop.f32.mrf.mxu0  ;;  %v317_v46 = vpop.f32.mrf.mxu1 }
 0x105   :  { %v332_v47 = vrot.slane %v324_v43, %v3390_v40  ;;  %v339_v48 = vrot.slane %v325_v44, %v3390_v40 }
 0x106   :  { %v277_v50 = vpop.f32.mrf.mxu0  ;;  %v318_v51 = vpop.f32.mrf.mxu1 }
 0x107   :  { %v340_v52 = vcombine.low %v332_v47, %v339_v48  ;;  %v365_v48 = vld [vmem:[#allocation2 + $0x8] sm:$0xff] }
 0x109   :  { %v342_v53 = vadd.f32 %v340_v52, %v45_v49 }
 0x10b   :  { %v2697_v54 = vmul.f32 -1.442695, %v342_v53  ;;  %v350_v57 = vrot.slane %v342_v53, 6 }
 0x10d   :  { %3038 = vpow2.f32 %v2697_v54 }
 0x11a   :  { %v3039_v55 = vpop.eup %3038 }
 0x11b   :  { %v346_v56 = vadd.f32 1.0, %v3039_v55 }
 0x11d   :  { %3040 = vrcp.f32 %v346_v56 }
 0x11e   :  { %3042 = vtanh.f32 %v350_v57 }
 0x12a   :  { %v3041_v58 = vpop.eup %3040 }
 0x12b   :  { %v354_v59 = vrot.slane %v3041_v58, 2  ;;  %v3043_v60 = vpop.eup %3042  ;;  %v360_v33 = vrot.slane %v3041_v58, 4 }
 0x12c   :  { %v357_v62 = vmul.f32 %v3043_v60, %v3041_v58 }
 0x12d   :  { %v356_v61 = vmul.f32 0.0, %v354_v59 }
 0x12f   :  { %v3394_v63 = vadd.f32 %v357_v62, %v356_v61 }
 0x131   :  { %3044 = vtanh.f32 %v3394_v63 }
 0x13e   :  { %v3045_v34 = vpop.eup %3044 }
 0x13f   :  { %v362_v35 = vmul.f32 %v3045_v34, %v360_v33 }
 0x141   :  { %363 = vst [vmem:[#allocation7] sm:$0x3] %v362_v35  ;;  %v366_v36 = vpack.c.bf16 %v362_v35, %v362_v35  ;;  %v3481_v35 = vld [vmem:[#allocation5 + $0xe0] ss:$16 sps:$4 sm:$0xff]  }
 0x143   :  { %592 = vmatmul.mubr.bf16.vlgmr.msra.gmra.mxu0 %v366_v36  ;;  %633 = vmatmul.mubr.bf16.vlgmr.msra.gmra.mxu1 %v366_v36  ;;  %v3483_v36 = vld [vmem:[#allocation5 + $0xe8] ss:$16 sps:$4 sm:$0xff]  }
 0x144   :  { %882 = vmatpush1.bf16.msra.mxu0 %v3261_v3  ;;  %923 = vmatpush1.bf16.msra.mxu1 %v3263_v4 }
 0x145   :  { %883 = vmatprep.subr.bf16.mxu0 %v3266_v5  ;;  %924 = vmatprep.subr.bf16.mxu1 %v3270_v6 }
 0x146   :  { %913 = vmatprep.mubr.bf16.mxu0 %v3216_v0  ;;  %954 = vmatprep.mubr.bf16.mxu1 %v3216_v0 }
 0x148   :  { %884 = vmatpush1.bf16.msra.mxu0 %v3272_v7  ;;  %925 = vmatpush1.bf16.msra.mxu1 %v3275_v8 }
 0x149   :  { %885 = vmatprep.subr.bf16.mxu0 %v3278_v9  ;;  %926 = vmatprep.subr.bf16.mxu1 %v3280_v10 }
 0x14c   :  { %886 = vmatpush1.bf16.msra.mxu0 %v3282_v11  ;;  %927 = vmatpush1.bf16.msra.mxu1 %v3284_v12 }
 0x14d   :  { %887 = vmatprep.subr.bf16.mxu0 %v3288_v13  ;;  %928 = vmatprep.subr.bf16.mxu1 %v3292_v14 }
 0x150   :  { %888 = vmatpush1.bf16.msra.mxu0 %v3294_v15  ;;  %929 = vmatpush1.bf16.msra.mxu1 %v3298_v16 }
 0x151   :  { %889 = vmatprep.subr.bf16.mxu0 %v3300_v17  ;;  %930 = vmatprep.subr.bf16.mxu1 %v3304_v18 }
 0x154   :  { %890 = vmatpush1.bf16.msra.mxu0 %v3306_v19  ;;  %931 = vmatpush1.bf16.msra.mxu1 %v3308_v20 }
 0x155   :  { %891 = vmatprep.subr.bf16.mxu0 %v3312_v21  ;;  %932 = vmatprep.subr.bf16.mxu1 %v3316_v22 }
 0x158   :  { %892 = vmatpush1.bf16.msra.mxu0 %v3318_v23  ;;  %933 = vmatpush1.bf16.msra.mxu1 %v3322_v24 }
 0x159   :  { %893 = vmatprep.subr.bf16.mxu0 %v3324_v25  ;;  %934 = vmatprep.subr.bf16.mxu1 %v3328_v26 }
 0x15c   :  { %894 = vmatpush1.bf16.msra.mxu0 %v3330_v27  ;;  %935 = vmatpush1.bf16.msra.mxu1 %v3332_v28 }
 0x15d   :  { %895 = vmatprep.subr.bf16.mxu0 %v3334_v29  ;;  %936 = vmatprep.subr.bf16.mxu1 %v3336_v30 }
 0x160   :  { %896 = vmatpush1.bf16.msra.mxu0 %v3342_v31  ;;  %937 = vmatpush1.bf16.msra.mxu1 %v3344_v32 }
 0x161   :  { %1203 = vmatprep.subr.bf16.mxu0 %v3256_v1  ;;  %1244 = vmatprep.subr.bf16.mxu1 %v3258_v2 }
 0x203   :  { %v593_v37 = vpop.f32.mrf.mxu0  ;;  %v634_v38 = vpop.f32.mrf.mxu1 }
 0x205   :  { %v595_v39 = vpop.f32.mrf.mxu0  ;;  %v636_v41 = vpop.f32.mrf.mxu1 }
 0x206   :  { %v645_v42 = vcombine.low %v593_v37, %v595_v39  ;;  %v646_v43 = vcombine.low %v634_v38, %v636_v41  ;;  %v3489_v37 = vld [vmem:[#allocation5 + $0xc4] ss:$16 sps:$4 sm:$0xff]   ;;  %v3491_v38 = vld [vmem:[#allocation5 + $0xcc] ss:$16 sps:$4 sm:$0xff]   ;;  %v3493_v39 = vld [vmem:[#allocation5 + $0xc0] ss:$16 sps:$4 sm:$0xff]  }
 0x207   :  { %v597_v44 = vpop.f32.mrf.mxu0  ;;  %v638_v45 = vpop.f32.mrf.mxu1  ;;  %v3495_v41 = vld [vmem:[#allocation5 + $0xc8] ss:$16 sps:$4 sm:$0xff]  }
 0x208   :  { %v653_v46 = vrot.slane %v645_v42, %v3390_v40  ;;  %v660_v47 = vrot.slane %v646_v43, %v3390_v40  ;;  %v3501_v42 = vld [vmem:[#allocation5 + $0xa4] ss:$16 sps:$4 sm:$0xff]   ;;  %v3503_v43 = vld [vmem:[#allocation5 + $0xac] ss:$16 sps:$4 sm:$0xff]   ;;  %v3505_v44 = vld [vmem:[#allocation5 + $0xa0] ss:$16 sps:$4 sm:$0xff]  }
 0x209   :  { %v598_v49 = vpop.f32.mrf.mxu0  ;;  %v639_v50 = vpop.f32.mrf.mxu1  ;;  %v3507_v45 = vld [vmem:[#allocation5 + $0xa8] ss:$16 sps:$4 sm:$0xff]  }
 0x20a   :  { %v661_v51 = vcombine.low %v653_v46, %v660_v47  ;;  %v3513_v46 = vld [vmem:[#allocation5 + $0x84] ss:$16 sps:$4 sm:$0xff]   ;;  %v3515_v47 = vld [vmem:[#allocation5 + $0x8c] ss:$16 sps:$4 sm:$0xff]   ;;  %v3519_v49 = vld [vmem:[#allocation5 + $0x88] ss:$16 sps:$4 sm:$0xff]  }
 0x20b   :  { %v3523_v50 = vld [vmem:[#allocation5 + $0x64] ss:$16 sps:$4 sm:$0xff]  }
 0x20c   :  { %v663_v52 = vadd.f32 %v661_v51, %v365_v48  ;;  %v3517_v48 = vld [vmem:[#allocation5 + $0x80] ss:$16 sps:$4 sm:$0xff]   ;;  %v3525_v51 = vld [vmem:[#allocation5 + $0x6c] ss:$16 sps:$4 sm:$0xff]  }
 0x20e   :  { %v2730_v1 = vmul.f32 -1.442695, %v663_v52  ;;  %v671_v54 = vrot.slane %v663_v52, 6  ;;  %v3529_v52 = vld [vmem:[#allocation5 + $0x60] ss:$16 sps:$4 sm:$0xff]  }
 0x210   :  { %3046 = vpow2.f32 %v2730_v1  ;;  %v3531_v1 = vld [vmem:[#allocation5 + $0x68] ss:$16 sps:$4 sm:$0xff]  }
 0x21d   :  { %v3047_v2 = vpop.eup %3046 }
 0x21e   :  { %v667_v53 = vadd.f32 1.0, %v3047_v2  ;;  %v3535_v2 = vld [vmem:[#allocation5 + $0x44] ss:$16 sps:$4 sm:$0xff]  }
 0x220   :  { %3048 = vrcp.f32 %v667_v53  ;;  %v3537_v53 = vld [vmem:[#allocation5 + $0x4c] ss:$16 sps:$4 sm:$0xff]  }
 0x221   :  { %3050 = vtanh.f32 %v671_v54  ;;  %v3541_v54 = vld [vmem:[#allocation5 + $0x40] ss:$16 sps:$4 sm:$0xff]  }
 0x22d   :  { %v3049_v55 = vpop.eup %3048 }
 0x22e   :  { %v675_v56 = vrot.slane %v3049_v55, 2  ;;  %v3051_v57 = vpop.eup %3050  ;;  %v681_v61 = vrot.slane %v3049_v55, 4 }
 0x22f   :  { %v678_v59 = vmul.f32 %v3051_v57, %v3049_v55  ;;  %v3543_v55 = vld [vmem:[#allocation5 + $0x48] ss:$16 sps:$4 sm:$0xff]   ;;  %v3549_v57 = vld [vmem:[#allocation5 + $0x2c] ss:$16 sps:$4 sm:$0xff]  }
 0x230   :  { %v677_v58 = vmul.f32 %v675_v56, %v3394_v63  ;;  %v3479_v63 = vld [vmem:[#allocation5 + $0xec] ss:$16 sps:$4 sm:$0xff]   ;;  %v3547_v56 = vld [vmem:[#allocation5 + $0x24] ss:$16 sps:$4 sm:$0xff]  }
 0x232   :  { %v3434_v60 = vadd.f32 %v678_v59, %v677_v58  ;;  %v3553_v58 = vld [vmem:[#allocation5 + $0x20] ss:$16 sps:$4 sm:$0xff]   ;;  %v3555_v59 = vld [vmem:[#allocation5 + $0x28] ss:$16 sps:$4 sm:$0xff]  }
 0x234   :  { %3052 = vtanh.f32 %v3434_v60 }
 0x241   :  { %v3053_v62 = vpop.eup %3052 }
 0x242   :  { %v683_v33 = vmul.f32 %v3053_v62, %v681_v61  ;;  %v3561_v61 = vld [vmem:[#allocation5 + $0xc] ss:$16 sps:$4 sm:$0xff]   ;;  %v3565_v62 = vld [vmem:[#allocation5] ss:$16 sps:$4 sm:$0xff]  }
 0x244   :  { %685 = vst [vmem:[#allocation7 + $0x2] sm:$0x3] %v683_v33  ;;  %v688_v34 = vpack.c.bf16 %v683_v33, %v683_v33  ;;  %v3567_v33 = vld [vmem:[#allocation5 + $0x8] ss:$16 sps:$4 sm:$0xff]  }
 0x246   :  { %914 = vmatmul.mubr.bf16.vlgmr.msra.gmra.mxu0 %v688_v34  ;;  %955 = vmatmul.mubr.bf16.vlgmr.msra.gmra.mxu1 %v688_v34 }
 0x247   :  { %1204 = vmatpush1.bf16.msra.mxu0 %v3261_v3  ;;  %1245 = vmatpush1.bf16.msra.mxu1 %v3263_v4 }
 0x248   :  { %1205 = vmatprep.subr.bf16.mxu0 %v3266_v5  ;;  %1246 = vmatprep.subr.bf16.mxu1 %v3270_v6 }
 0x249   :  { %1235 = vmatprep.mubr.bf16.mxu0 %v3216_v0  ;;  %1276 = vmatprep.mubr.bf16.mxu1 %v3216_v0 }
 0x24b   :  { %1206 = vmatpush1.bf16.msra.mxu0 %v3272_v7  ;;  %1247 = vmatpush1.bf16.msra.mxu1 %v3275_v8 }
 0x24c   :  { %1207 = vmatprep.subr.bf16.mxu0 %v3278_v9  ;;  %1248 = vmatprep.subr.bf16.mxu1 %v3280_v10 }
 0x24f   :  { %1208 = vmatpush1.bf16.msra.mxu0 %v3282_v11  ;;  %1249 = vmatpush1.bf16.msra.mxu1 %v3284_v12 }
 0x250   :  { %1209 = vmatprep.subr.bf16.mxu0 %v3288_v13  ;;  %1250 = vmatprep.subr.bf16.mxu1 %v3292_v14  ;;  %v687_v13 = vld [vmem:[#allocation2 + $0x10] sm:$0xff] }
 0x253   :  { %1210 = vmatpush1.bf16.msra.mxu0 %v3294_v15  ;;  %1251 = vmatpush1.bf16.msra.mxu1 %v3298_v16 }
 0x254   :  { %1211 = vmatprep.subr.bf16.mxu0 %v3300_v17  ;;  %1252 = vmatprep.subr.bf16.mxu1 %v3304_v18 }
 0x257   :  { %1212 = vmatpush1.bf16.msra.mxu0 %v3306_v19  ;;  %1253 = vmatpush1.bf16.msra.mxu1 %v3308_v20 }
 0x258   :  { %1213 = vmatprep.subr.bf16.mxu0 %v3312_v21  ;;  %1254 = vmatprep.subr.bf16.mxu1 %v3316_v22 }
 0x25b   :  { %1214 = vmatpush1.bf16.msra.mxu0 %v3318_v23  ;;  %1255 = vmatpush1.bf16.msra.mxu1 %v3322_v24 }
 0x25c   :  { %1215 = vmatprep.subr.bf16.mxu0 %v3324_v25  ;;  %1256 = vmatprep.subr.bf16.mxu1 %v3328_v26 }
 0x25f   :  { %1216 = vmatpush1.bf16.msra.mxu0 %v3330_v27  ;;  %1257 = vmatpush1.bf16.msra.mxu1 %v3332_v28 }
 0x260   :  { %1217 = vmatprep.subr.bf16.mxu0 %v3334_v29  ;;  %1258 = vmatprep.subr.bf16.mxu1 %v3336_v30 }
 0x263   :  { %1218 = vmatpush1.bf16.msra.mxu0 %v3342_v31  ;;  %1259 = vmatpush1.bf16.msra.mxu1 %v3344_v32  ;;  %v3477_v32 = vld [vmem:[#allocation5 + $0xe4] ss:$16 sps:$4 sm:$0xff]  }
 0x264   :  { %1525 = vmatprep.subr.bf16.mxu0 %v3477_v32  ;;  %1566 = vmatprep.subr.bf16.mxu1 %v3479_v63 }
 0x306   :  { %v915_v3 = vpop.f32.mrf.mxu0  ;;  %v956_v4 = vpop.f32.mrf.mxu1 }
 0x308   :  { %v917_v5 = vpop.f32.mrf.mxu0  ;;  %v958_v6 = vpop.f32.mrf.mxu1 }
 0x309   :  { %v967_v7 = vcombine.low %v915_v3, %v917_v5  ;;  %v968_v8 = vcombine.low %v956_v4, %v958_v6 }
 0x30a   :  { %v919_v9 = vpop.f32.mrf.mxu0  ;;  %v960_v10 = vpop.f32.mrf.mxu1 }
 0x30b   :  { %v975_v11 = vrot.slane %v967_v7, %v3390_v40  ;;  %v982_v12 = vrot.slane %v968_v8, %v3390_v40 }
 0x30c   :  { %v920_v14 = vpop.f32.mrf.mxu0  ;;  %v961_v15 = vpop.f32.mrf.mxu1 }
 0x30d   :  { %v983_v16 = vcombine.low %v975_v11, %v982_v12  ;;  %v1009_v12 = vld [vmem:[#allocation2 + $0x18] sm:$0xff] }
 0x30f   :  { %v985_v17 = vadd.f32 %v983_v16, %v687_v13 }
 0x311   :  { %v2763_v18 = vmul.f32 -1.442695, %v985_v17  ;;  %v993_v21 = vrot.slane %v985_v17, 6 }
 0x313   :  { %3054 = vpow2.f32 %v2763_v18 }
 0x320   :  { %v3055_v19 = vpop.eup %3054 }
 0x321   :  { %v989_v20 = vadd.f32 1.0, %v3055_v19 }
 0x323   :  { %3056 = vrcp.f32 %v989_v20 }
 0x324   :  { %3058 = vtanh.f32 %v993_v21 }
 0x330   :  { %v3057_v22 = vpop.eup %3056 }
 0x331   :  { %v997_v23 = vrot.slane %v3057_v22, 2  ;;  %v3059_v24 = vpop.eup %3058  ;;  %v1003_v28 = vrot.slane %v3057_v22, 4 }
 0x332   :  { %v1000_v26 = vmul.f32 %v3059_v24, %v3057_v22 }
 0x333   :  { %v999_v25 = vmul.f32 %v997_v23, %v3434_v60  ;;  %v3559_v60 = vld [vmem:[#allocation5 + $0x4] ss:$16 sps:$4 sm:$0xff]  }
 0x335   :  { %v3472_v27 = vadd.f32 %v1000_v26, %v999_v25 }
 0x337   :  { %3060 = vtanh.f32 %v3472_v27 }
 0x344   :  { %v3061_v29 = vpop.eup %3060 }
 0x345   :  { %v1005_v30 = vmul.f32 %v3061_v29, %v1003_v28 }
 0x347   :  { %1007 = vst [vmem:[#allocation7 + $0x4] sm:$0x3] %v1005_v30  ;;  %v1010_v31 = vpack.c.bf16 %v1005_v30, %v1005_v30 }
 0x349   :  { %1236 = vmatmul.mubr.bf16.vlgmr.msra.gmra.mxu0 %v1010_v31  ;;  %1277 = vmatmul.mubr.bf16.vlgmr.msra.gmra.mxu1 %v1010_v31 }
 0x34a   :  { %1557 = vmatprep.mubr.bf16.mxu0 %v3216_v0  ;;  %1598 = vmatprep.mubr.bf16.mxu1 %v3216_v0 }
 0x34b   :  { %1526 = vmatpush1.bf16.msra.mxu0 %v3481_v35  ;;  %1567 = vmatpush1.bf16.msra.mxu1 %v3483_v36 }
 0x34c   :  { %1527 = vmatprep.subr.bf16.mxu0 %v3489_v37  ;;  %1568 = vmatprep.subr.bf16.mxu1 %v3491_v38 }
 0x34f   :  { %1528 = vmatpush1.bf16.msra.mxu0 %v3493_v39  ;;  %1569 = vmatpush1.bf16.msra.mxu1 %v3495_v41 }
 0x350   :  { %1529 = vmatprep.subr.bf16.mxu0 %v3501_v42  ;;  %1570 = vmatprep.subr.bf16.mxu1 %v3503_v43 }
 0x353   :  { %1530 = vmatpush1.bf16.msra.mxu0 %v3505_v44  ;;  %1571 = vmatpush1.bf16.msra.mxu1 %v3507_v45 }
 0x354   :  { %1531 = vmatprep.subr.bf16.mxu0 %v3513_v46  ;;  %1572 = vmatprep.subr.bf16.mxu1 %v3515_v47 }
 0x357   :  { %1532 = vmatpush1.bf16.msra.mxu0 %v3517_v48  ;;  %1573 = vmatpush1.bf16.msra.mxu1 %v3519_v49 }
 0x358   :  { %1533 = vmatprep.subr.bf16.mxu0 %v3523_v50  ;;  %1574 = vmatprep.subr.bf16.mxu1 %v3525_v51 }
 0x35b   :  { %1534 = vmatpush1.bf16.msra.mxu0 %v3529_v52  ;;  %1575 = vmatpush1.bf16.msra.mxu1 %v3531_v1 }
 0x35c   :  { %1535 = vmatprep.subr.bf16.mxu0 %v3535_v2  ;;  %1576 = vmatprep.subr.bf16.mxu1 %v3537_v53 }
 0x35f   :  { %1536 = vmatpush1.bf16.msra.mxu0 %v3541_v54  ;;  %1577 = vmatpush1.bf16.msra.mxu1 %v3543_v55 }
 0x360   :  { %1537 = vmatprep.subr.bf16.mxu0 %v3547_v56  ;;  %1578 = vmatprep.subr.bf16.mxu1 %v3549_v57 }
 0x363   :  { %1538 = vmatpush1.bf16.msra.mxu0 %v3553_v58  ;;  %1579 = vmatpush1.bf16.msra.mxu1 %v3555_v59 }
 0x364   :  { %1539 = vmatprep.subr.bf16.mxu0 %v3559_v60  ;;  %1580 = vmatprep.subr.bf16.mxu1 %v3561_v61 }
 0x367   :  { %1540 = vmatpush1.bf16.msra.mxu0 %v3565_v62  ;;  %1581 = vmatpush1.bf16.msra.mxu1 %v3567_v33 }
 0x368   :  { %1847 = vmatprep.subr.bf16.mxu0 %v3477_v32  ;;  %1888 = vmatprep.subr.bf16.mxu1 %v3479_v63 }
 0x409   :  { %v1237_v34 = vpop.f32.mrf.mxu0  ;;  %v1278_v3 = vpop.f32.mrf.mxu1 }
 0x40b   :  { %v1239_v4 = vpop.f32.mrf.mxu0  ;;  %v1280_v5 = vpop.f32.mrf.mxu1 }
 0x40c   :  { %v1289_v6 = vcombine.low %v1237_v34, %v1239_v4  ;;  %v1290_v7 = vcombine.low %v1278_v3, %v1280_v5 }
 0x40d   :  { %v1241_v8 = vpop.f32.mrf.mxu0  ;;  %v1282_v9 = vpop.f32.mrf.mxu1 }
 0x40e   :  { %v1297_v10 = vrot.slane %v1289_v6, %v3390_v40  ;;  %v1304_v11 = vrot.slane %v1290_v7, %v3390_v40 }
 0x40f   :  { %v1242_v13 = vpop.f32.mrf.mxu0  ;;  %v1283_v14 = vpop.f32.mrf.mxu1 }
 0x410   :  { %v1305_v15 = vcombine.low %v1297_v10, %v1304_v11  ;;  %v1331_v11 = vld [vmem:[#allocation2 + $0x20] sm:$0xff] }
 0x412   :  { %v1307_v16 = vadd.f32 %v1305_v15, %v1009_v12 }
 0x414   :  { %v2796_v17 = vmul.f32 -1.442695, %v1307_v16  ;;  %v1315_v20 = vrot.slane %v1307_v16, 6 }
 0x416   :  { %3062 = vpow2.f32 %v2796_v17 }
 0x423   :  { %v3063_v18 = vpop.eup %3062 }
 0x424   :  { %v1311_v19 = vadd.f32 1.0, %v3063_v18 }
 0x426   :  { %3064 = vrcp.f32 %v1311_v19 }
 0x427   :  { %3066 = vtanh.f32 %v1315_v20 }
 0x433   :  { %v3065_v21 = vpop.eup %3064 }
 0x434   :  { %v1319_v22 = vrot.slane %v3065_v21, 2  ;;  %v3067_v23 = vpop.eup %3066  ;;  %v1325_v28 = vrot.slane %v3065_v21, 4 }
 0x435   :  { %v1322_v25 = vmul.f32 %v3067_v23, %v3065_v21 }
 0x436   :  { %v1321_v24 = vmul.f32 %v1319_v22, %v3472_v27 }
 0x438   :  { %v3578_v26 = vadd.f32 %v1322_v25, %v1321_v24 }
 0x43a   :  { %3068 = vtanh.f32 %v3578_v26 }
 0x447   :  { %v3069_v29 = vpop.eup %3068 }
 0x448   :  { %v1327_v30 = vmul.f32 %v3069_v29, %v1325_v28 }
 0x44a   :  { %1329 = vst [vmem:[#allocation7 + $0x6] sm:$0x3] %v1327_v30  ;;  %v1332_v31 = vpack.c.bf16 %v1327_v30, %v1327_v30 }
 0x44c   :  { %1558 = vmatmul.mubr.bf16.vlgmr.msra.gmra.mxu0 %v1332_v31  ;;  %1599 = vmatmul.mubr.bf16.vlgmr.msra.gmra.mxu1 %v1332_v31 }
 0x44d   :  { %1848 = vmatpush1.bf16.msra.mxu0 %v3481_v35  ;;  %1889 = vmatpush1.bf16.msra.mxu1 %v3483_v36 }
 0x44e   :  { %1849 = vmatprep.subr.bf16.mxu0 %v3489_v37  ;;  %1890 = vmatprep.subr.bf16.mxu1 %v3491_v38 }
 0x44f   :  { %1879 = vmatprep.mubr.bf16.mxu0 %v3216_v0  ;;  %1920 = vmatprep.mubr.bf16.mxu1 %v3216_v0 }
 0x451   :  { %1850 = vmatpush1.bf16.msra.mxu0 %v3493_v39  ;;  %1891 = vmatpush1.bf16.msra.mxu1 %v3495_v41 }
 0x452   :  { %1851 = vmatprep.subr.bf16.mxu0 %v3501_v42  ;;  %1892 = vmatprep.subr.bf16.mxu1 %v3503_v43 }
 0x455   :  { %1852 = vmatpush1.bf16.msra.mxu0 %v3505_v44  ;;  %1893 = vmatpush1.bf16.msra.mxu1 %v3507_v45 }
 0x456   :  { %1853 = vmatprep.subr.bf16.mxu0 %v3513_v46  ;;  %1894 = vmatprep.subr.bf16.mxu1 %v3515_v47 }
 0x459   :  { %1854 = vmatpush1.bf16.msra.mxu0 %v3517_v48  ;;  %1895 = vmatpush1.bf16.msra.mxu1 %v3519_v49 }
 0x45a   :  { %1855 = vmatprep.subr.bf16.mxu0 %v3523_v50  ;;  %1896 = vmatprep.subr.bf16.mxu1 %v3525_v51 }
 0x45d   :  { %1856 = vmatpush1.bf16.msra.mxu0 %v3529_v52  ;;  %1897 = vmatpush1.bf16.msra.mxu1 %v3531_v1 }
 0x45e   :  { %1857 = vmatprep.subr.bf16.mxu0 %v3535_v2  ;;  %1898 = vmatprep.subr.bf16.mxu1 %v3537_v53 }
 0x461   :  { %1858 = vmatpush1.bf16.msra.mxu0 %v3541_v54  ;;  %1899 = vmatpush1.bf16.msra.mxu1 %v3543_v55 }
 0x462   :  { %1859 = vmatprep.subr.bf16.mxu0 %v3547_v56  ;;  %1900 = vmatprep.subr.bf16.mxu1 %v3549_v57 }
 0x465   :  { %1860 = vmatpush1.bf16.msra.mxu0 %v3553_v58  ;;  %1901 = vmatpush1.bf16.msra.mxu1 %v3555_v59 }
 0x466   :  { %1861 = vmatprep.subr.bf16.mxu0 %v3559_v60  ;;  %1902 = vmatprep.subr.bf16.mxu1 %v3561_v61 }
 0x469   :  { %1862 = vmatpush1.bf16.msra.mxu0 %v3565_v62  ;;  %1903 = vmatpush1.bf16.msra.mxu1 %v3567_v33 }
 0x46a   :  { %2169 = vmatprep.subr.bf16.mxu0 %v3477_v32  ;;  %2210 = vmatprep.subr.bf16.mxu1 %v3479_v63 }
 0x50c   :  { %v1559_v27 = vpop.f32.mrf.mxu0  ;;  %v1600_v34 = vpop.f32.mrf.mxu1 }
 0x50e   :  { %v1561_v3 = vpop.f32.mrf.mxu0  ;;  %v1602_v4 = vpop.f32.mrf.mxu1 }
 0x50f   :  { %v1611_v5 = vcombine.low %v1559_v27, %v1561_v3  ;;  %v1612_v6 = vcombine.low %v1600_v34, %v1602_v4 }
 0x510   :  { %v1563_v7 = vpop.f32.mrf.mxu0  ;;  %v1604_v8 = vpop.f32.mrf.mxu1 }
 0x511   :  { %v1619_v9 = vrot.slane %v1611_v5, %v3390_v40  ;;  %v1626_v10 = vrot.slane %v1612_v6, %v3390_v40 }
 0x512   :  { %v1564_v12 = vpop.f32.mrf.mxu0  ;;  %v1605_v13 = vpop.f32.mrf.mxu1 }
 0x513   :  { %v1627_v14 = vcombine.low %v1619_v9, %v1626_v10  ;;  %v1653_v10 = vld [vmem:[#allocation2 + $0x28] sm:$0xff] }
 0x515   :  { %v1629_v15 = vadd.f32 %v1627_v14, %v1331_v11 }
 0x517   :  { %v2829_v16 = vmul.f32 -1.442695, %v1629_v15  ;;  %v1637_v19 = vrot.slane %v1629_v15, 6 }
 0x519   :  { %3070 = vpow2.f32 %v2829_v16 }
 0x526   :  { %v3071_v17 = vpop.eup %3070 }
 0x527   :  { %v1633_v18 = vadd.f32 1.0, %v3071_v17 }
 0x529   :  { %3072 = vrcp.f32 %v1633_v18 }
 0x52a   :  { %3074 = vtanh.f32 %v1637_v19 }
 0x536   :  { %v3073_v20 = vpop.eup %3072 }
 0x537   :  { %v1641_v21 = vrot.slane %v3073_v20, 2  ;;  %v3075_v22 = vpop.eup %3074  ;;  %v1647_v28 = vrot.slane %v3073_v20, 4 }
 0x538   :  { %v1644_v24 = vmul.f32 %v3075_v22, %v3073_v20 }
 0x539   :  { %v1643_v23 = vmul.f32 %v1641_v21, %v3578_v26 }
 0x53b   :  { %v3618_v25 = vadd.f32 %v1644_v24, %v1643_v23 }
 0x53d   :  { %3076 = vtanh.f32 %v3618_v25 }
 0x54a   :  { %v3077_v29 = vpop.eup %3076 }
 0x54b   :  { %v1649_v30 = vmul.f32 %v3077_v29, %v1647_v28 }
 0x54d   :  { %1651 = vst [vmem:[#allocation7 + $0x8] sm:$0x3] %v1649_v30  ;;  %v1654_v31 = vpack.c.bf16 %v1649_v30, %v1649_v30 }
 0x54f   :  { %1880 = vmatmul.mubr.bf16.vlgmr.msra.gmra.mxu0 %v1654_v31  ;;  %1921 = vmatmul.mubr.bf16.vlgmr.msra.gmra.mxu1 %v1654_v31 }
 0x550   :  { %2170 = vmatpush1.bf16.msra.mxu0 %v3481_v35  ;;  %2211 = vmatpush1.bf16.msra.mxu1 %v3483_v36 }
 0x551   :  { %2171 = vmatprep.subr.bf16.mxu0 %v3489_v37  ;;  %2212 = vmatprep.subr.bf16.mxu1 %v3491_v38 }
 0x552   :  { %2201 = vmatprep.mubr.bf16.mxu0 %v3216_v0  ;;  %2242 = vmatprep.mubr.bf16.mxu1 %v3216_v0 }
 0x554   :  { %2172 = vmatpush1.bf16.msra.mxu0 %v3493_v39  ;;  %2213 = vmatpush1.bf16.msra.mxu1 %v3495_v41 }
 0x555   :  { %2173 = vmatprep.subr.bf16.mxu0 %v3501_v42  ;;  %2214 = vmatprep.subr.bf16.mxu1 %v3503_v43 }
 0x558   :  { %2174 = vmatpush1.bf16.msra.mxu0 %v3505_v44  ;;  %2215 = vmatpush1.bf16.msra.mxu1 %v3507_v45 }
 0x559   :  { %2175 = vmatprep.subr.bf16.mxu0 %v3513_v46  ;;  %2216 = vmatprep.subr.bf16.mxu1 %v3515_v47 }
 0x55c   :  { %2176 = vmatpush1.bf16.msra.mxu0 %v3517_v48  ;;  %2217 = vmatpush1.bf16.msra.mxu1 %v3519_v49 }
 0x55d   :  { %2177 = vmatprep.subr.bf16.mxu0 %v3523_v50  ;;  %2218 = vmatprep.subr.bf16.mxu1 %v3525_v51 }
 0x560   :  { %2178 = vmatpush1.bf16.msra.mxu0 %v3529_v52  ;;  %2219 = vmatpush1.bf16.msra.mxu1 %v3531_v1 }
 0x561   :  { %2179 = vmatprep.subr.bf16.mxu0 %v3535_v2  ;;  %2220 = vmatprep.subr.bf16.mxu1 %v3537_v53 }
 0x564   :  { %2180 = vmatpush1.bf16.msra.mxu0 %v3541_v54  ;;  %2221 = vmatpush1.bf16.msra.mxu1 %v3543_v55 }
 0x565   :  { %2181 = vmatprep.subr.bf16.mxu0 %v3547_v56  ;;  %2222 = vmatprep.subr.bf16.mxu1 %v3549_v57 }
 0x568   :  { %2182 = vmatpush1.bf16.msra.mxu0 %v3553_v58  ;;  %2223 = vmatpush1.bf16.msra.mxu1 %v3555_v59 }
 0x569   :  { %2183 = vmatprep.subr.bf16.mxu0 %v3559_v60  ;;  %2224 = vmatprep.subr.bf16.mxu1 %v3561_v61 }
 0x56c   :  { %2184 = vmatpush1.bf16.msra.mxu0 %v3565_v62  ;;  %2225 = vmatpush1.bf16.msra.mxu1 %v3567_v33 }
 0x56d   :  { %2491 = vmatprep.subr.bf16.mxu0 %v3477_v32  ;;  %2532 = vmatprep.subr.bf16.mxu1 %v3479_v63 }
 0x60f   :  { %v1881_v26 = vpop.f32.mrf.mxu0  ;;  %v1922_v27 = vpop.f32.mrf.mxu1 }
 0x611   :  { %v1883_v34 = vpop.f32.mrf.mxu0  ;;  %v1924_v3 = vpop.f32.mrf.mxu1 }
 0x612   :  { %v1933_v4 = vcombine.low %v1881_v26, %v1883_v34  ;;  %v1934_v5 = vcombine.low %v1922_v27, %v1924_v3 }
 0x613   :  { %v1885_v6 = vpop.f32.mrf.mxu0  ;;  %v1926_v7 = vpop.f32.mrf.mxu1 }
 0x614   :  { %v1941_v8 = vrot.slane %v1933_v4, %v3390_v40  ;;  %v1948_v9 = vrot.slane %v1934_v5, %v3390_v40  ;;  %v2297_v5 = vld [vmem:[#allocation2 + $0x38] sm:$0xff] }
 0x615   :  { %v1886_v11 = vpop.f32.mrf.mxu0  ;;  %v1927_v12 = vpop.f32.mrf.mxu1 }
 0x616   :  { %v1949_v13 = vcombine.low %v1941_v8, %v1948_v9 }
 0x618   :  { %v1951_v14 = vadd.f32 %v1949_v13, %v1653_v10 }
 0x61a   :  { %v2862_v32 = vmul.f32 -1.442695, %v1951_v14  ;;  %v1959_v16 = vrot.slane %v1951_v14, 6 }
 0x61c   :  { %3078 = vpow2.f32 %v2862_v32 }
 0x629   :  { %v3079_v63 = vpop.eup %3078 }
 0x62a   :  { %v1955_v15 = vadd.f32 1.0, %v3079_v63 }
 0x62c   :  { %3080 = vrcp.f32 %v1955_v15 }
 0x62d   :  { %3082 = vtanh.f32 %v1959_v16 }
 0x639   :  { %v3081_v17 = vpop.eup %3080 }
 0x63a   :  { %v1963_v18 = vrot.slane %v3081_v17, 2  ;;  %v3083_v19 = vpop.eup %3082  ;;  %v1969_v23 = vrot.slane %v3081_v17, 4 }
 0x63b   :  { %v1966_v21 = vmul.f32 %v3083_v19, %v3081_v17 }
 0x63c   :  { %v1965_v20 = vmul.f32 %v1963_v18, %v3618_v25 }
 0x63e   :  { %v3658_v22 = vadd.f32 %v1966_v21, %v1965_v20 }
 0x640   :  { %3084 = vtanh.f32 %v3658_v22 }
 0x64d   :  { %v3085_v24 = vpop.eup %3084 }
 0x64e   :  { %v1971_v28 = vmul.f32 %v3085_v24, %v1969_v23 }
 0x650   :  { %1973 = vst [vmem:[#allocation7 + $0xa] sm:$0x3] %v1971_v28  ;;  %v1976_v29 = vpack.c.bf16 %v1971_v28, %v1971_v28 }
 0x652   :  { %2202 = vmatmul.mubr.bf16.vlgmr.msra.gmra.mxu0 %v1976_v29  ;;  %2243 = vmatmul.mubr.bf16.vlgmr.msra.gmra.mxu1 %v1976_v29 }
 0x653   :  { %2492 = vmatpush1.bf16.msra.mxu0 %v3481_v35  ;;  %2533 = vmatpush1.bf16.msra.mxu1 %v3483_v36 }
 0x654   :  { %2493 = vmatprep.subr.bf16.mxu0 %v3489_v37  ;;  %2534 = vmatprep.subr.bf16.mxu1 %v3491_v38 }
 0x655   :  { %2523 = vmatprep.mubr.bf16.mxu0 %v3216_v0  ;;  %2564 = vmatprep.mubr.bf16.mxu1 %v3216_v0 }
 0x657   :  { %2494 = vmatpush1.bf16.msra.mxu0 %v3493_v39  ;;  %2535 = vmatpush1.bf16.msra.mxu1 %v3495_v41 }
 0x658   :  { %2495 = vmatprep.subr.bf16.mxu0 %v3501_v42  ;;  %2536 = vmatprep.subr.bf16.mxu1 %v3503_v43 }
 0x65b   :  { %2496 = vmatpush1.bf16.msra.mxu0 %v3505_v44  ;;  %2537 = vmatpush1.bf16.msra.mxu1 %v3507_v45  ;;  %v1975_v45 = vld [vmem:[#allocation2 + $0x30] sm:$0xff] }
 0x65c   :  { %2497 = vmatprep.subr.bf16.mxu0 %v3513_v46  ;;  %2538 = vmatprep.subr.bf16.mxu1 %v3515_v47 }
 0x65f   :  { %2498 = vmatpush1.bf16.msra.mxu0 %v3517_v48  ;;  %2539 = vmatpush1.bf16.msra.mxu1 %v3519_v49 }
 0x660   :  { %2499 = vmatprep.subr.bf16.mxu0 %v3523_v50  ;;  %2540 = vmatprep.subr.bf16.mxu1 %v3525_v51 }
 0x663   :  { %2500 = vmatpush1.bf16.msra.mxu0 %v3529_v52  ;;  %2541 = vmatpush1.bf16.msra.mxu1 %v3531_v1 }
 0x664   :  { %2501 = vmatprep.subr.bf16.mxu0 %v3535_v2  ;;  %2542 = vmatprep.subr.bf16.mxu1 %v3537_v53 }
 0x667   :  { %2502 = vmatpush1.bf16.msra.mxu0 %v3541_v54  ;;  %2543 = vmatpush1.bf16.msra.mxu1 %v3543_v55 }
 0x668   :  { %2503 = vmatprep.subr.bf16.mxu0 %v3547_v56  ;;  %2544 = vmatprep.subr.bf16.mxu1 %v3549_v57 }
 0x66b   :  { %2504 = vmatpush1.bf16.msra.mxu0 %v3553_v58  ;;  %2545 = vmatpush1.bf16.msra.mxu1 %v3555_v59 }
 0x66c   :  { %2505 = vmatprep.subr.bf16.mxu0 %v3559_v60  ;;  %2546 = vmatprep.subr.bf16.mxu1 %v3561_v61 }
 0x66f   :  { %2506 = vmatpush1.bf16.msra.mxu0 %v3565_v62  ;;  %2547 = vmatpush1.bf16.msra.mxu1 %v3567_v33 }
 0x712   :  { %v2203_v0 = vpop.f32.mrf.mxu0  ;;  %v2244_v35 = vpop.f32.mrf.mxu1 }
 0x714   :  { %v2205_v36 = vpop.f32.mrf.mxu0  ;;  %v2246_v37 = vpop.f32.mrf.mxu1 }
 0x715   :  { %v2255_v38 = vcombine.low %v2203_v0, %v2205_v36  ;;  %v2256_v39 = vcombine.low %v2244_v35, %v2246_v37 }
 0x716   :  { %v2207_v41 = vpop.f32.mrf.mxu0  ;;  %v2248_v42 = vpop.f32.mrf.mxu1 }
 0x717   :  { %v2263_v43 = vrot.slane %v2255_v38, %v3390_v40  ;;  %v2270_v44 = vrot.slane %v2256_v39, %v3390_v40 }
 0x718   :  { %v2208_v46 = vpop.f32.mrf.mxu0  ;;  %v2249_v47 = vpop.f32.mrf.mxu1 }
 0x719   :  { %v2271_v48 = vcombine.low %v2263_v43, %v2270_v44 }
 0x71b   :  { %v2273_v49 = vadd.f32 %v2271_v48, %v1975_v45 }
 0x71d   :  { %v2895_v50 = vmul.f32 -1.442695, %v2273_v49  ;;  %v2281_v1 = vrot.slane %v2273_v49, 6 }
 0x71f   :  { %3086 = vpow2.f32 %v2895_v50 }
 0x72c   :  { %v3087_v51 = vpop.eup %3086 }
 0x72d   :  { %v2277_v52 = vadd.f32 1.0, %v3087_v51 }
 0x72f   :  { %3088 = vrcp.f32 %v2277_v52 }
 0x730   :  { %3090 = vtanh.f32 %v2281_v1 }
 0x73c   :  { %v3089_v2 = vpop.eup %3088 }
 0x73d   :  { %v2285_v53 = vrot.slane %v3089_v2, 2  ;;  %v3091_v54 = vpop.eup %3090  ;;  %v2291_v58 = vrot.slane %v3089_v2, 4 }
 0x73e   :  { %v2288_v56 = vmul.f32 %v3091_v54, %v3089_v2 }
 0x73f   :  { %v2287_v55 = vmul.f32 %v2285_v53, %v3658_v22 }
 0x741   :  { %v2289_v57 = vadd.f32 %v2288_v56, %v2287_v55 }
 0x743   :  { %3092 = vtanh.f32 %v2289_v57 }
 0x750   :  { %v3093_v59 = vpop.eup %3092 }
 0x751   :  { %v2293_v60 = vmul.f32 %v3093_v59, %v2291_v58 }
 0x753   :  { %2295 = vst [vmem:[#allocation7 + $0xc] sm:$0x3] %v2293_v60  ;;  %v2298_v61 = vpack.c.bf16 %v2293_v60, %v2293_v60 }
 0x755   :  { %2524 = vmatmul.mubr.bf16.vlgmr.msra.gmra.mxu0 %v2298_v61  ;;  %2565 = vmatmul.mubr.bf16.vlgmr.msra.gmra.mxu1 %v2298_v61 }
 0x815   :  { %v2525_v62 = vpop.f32.mrf.mxu0  ;;  %v2566_v33 = vpop.f32.mrf.mxu1 }
 0x817   :  { %v2527_v25 = vpop.f32.mrf.mxu0  ;;  %v2568_v30 = vpop.f32.mrf.mxu1 }
 0x818   :  { %v2577_v31 = vcombine.low %v2525_v62, %v2527_v25  ;;  %v2578_v26 = vcombine.low %v2566_v33, %v2568_v30 }
 0x819   :  { %v2529_v27 = vpop.f32.mrf.mxu0  ;;  %v2570_v34 = vpop.f32.mrf.mxu1 }
 0x81a   :  { %v2585_v3 = vrot.slane %v2577_v31, %v3390_v40  ;;  %v2592_v4 = vrot.slane %v2578_v26, %v3390_v40 }
 0x81b   :  { %v2530_v6 = vpop.f32.mrf.mxu0  ;;  %v2571_v7 = vpop.f32.mrf.mxu1 }
 0x81c   :  { %v2593_v8 = vcombine.low %v2585_v3, %v2592_v4 }
 0x81e   :  { %v2595_v9 = vadd.f32 %v2593_v8, %v2297_v5 }
 0x820   :  { %v2928_v10 = vmul.f32 -1.442695, %v2595_v9  ;;  %v2603_v13 = vrot.slane %v2595_v9, 6 }
 0x822   :  { %3094 = vpow2.f32 %v2928_v10 }
 0x82f   :  { %v3095_v11 = vpop.eup %3094 }
 0x830   :  { %v2599_v12 = vadd.f32 1.0, %v3095_v11 }
 0x832   :  { %3096 = vrcp.f32 %v2599_v12 }
 0x833   :  { %3098 = vtanh.f32 %v2603_v13 }
 0x83f   :  { %v3097_v14 = vpop.eup %3096 }
 0x840   :  { %v2607_v32 = vrot.slane %v3097_v14, 2  ;;  %v3099_v63 = vpop.eup %3098  ;;  %v2613_v40 = vrot.slane %v3097_v14, 4 }
 0x841   :  { %v2610_v16 = vmul.f32 %v3099_v63, %v3097_v14 }
 0x842   :  { %v2609_v15 = vmul.f32 %v2607_v32, %v2289_v57 }
 0x844   :  { %v2611_v17 = vadd.f32 %v2610_v16, %v2609_v15 }
 0x846   :  { %3100 = vtanh.f32 %v2611_v17  ;;  %2619 = vst [vmem:[#allocation10] sm:$0x3] %v2611_v17 }
 0x853   :  { %v3101_v18 = vpop.eup %3100 }
 0x854   :  { %v2615_v19 = vmul.f32 %v3101_v18, %v2613_v40 }
 0x856   :  { %2617 = vst [vmem:[#allocation7 + $0xe] sm:$0x3] %v2615_v19  ;;  %2618 = vst [vmem:[#allocation8] sm:$0x3] %v2615_v19 }
 0x857   :  { %3153 = shalt.err (!%p3150_p0)
}
 0x858   :  { %2641 = dma.vmem_to_hbm [thread:$0]  %s2639_s1, 32, %s3710_s3, [#allocation9]  }
 0x859   :  { %s3162_s10 = scalar_lea.vmem %s2626_s30, 256  ;;  %p3167_p2 = scmp.lt.s32.totalorder %s2626_s30, %s2626_s30 }
 0x85a   :  { %p3163_p1 = scmp.ne.s32.totalorder %s2626_s30, %s3162_s10  ;;  %p3168_p3 = scmp.lt.s32.totalorder %s3162_s10, %s3162_s10 }
 0x85c   :  { %p3169_p4 = por %p3168_p3, %p3167_p2 }
 0x85e   :  { %p3170_p5 = pnand %p3169_p4, %p3163_p1 }
 0x860   :  { %3173 = shalt.err (!%p3170_p5)
}
 0x861   :  { %s3221_s11 = smov 32   ;;  %s3222_s12 = smov 2  }
 0x862   :  { %2631 = dma.vmem_to_hbm [thread:$0]  %s2626_s30, 256, %s3709_s2, [#allocation4], %s3221_s11, %s3221_s11, %s3222_s12  }
 0x863   :  { %s3182_s15 = scalar_lea.vmem %s2649_s6, 32  ;;  %p3187_p7 = scmp.lt.s32.totalorder %s2649_s6, %s2649_s6 }
 0x864   :  { %p3183_p6 = scmp.ne.s32.totalorder %s2649_s6, %s3182_s15  ;;  %p3188_p8 = scmp.lt.s32.totalorder %s3182_s15, %s3182_s15 }
 0x866   :  { %p3189_p9 = por %p3188_p8, %p3187_p7 }
 0x868   :  { %p3190_p10 = pnand %p3189_p9, %p3183_p6 }
 0x86a   :  { %3193 = shalt.err (!%p3190_p10)
}
 0x86b   :  { %2651 = dma.vmem_to_hbm [thread:$0]  %s2649_s6, 32, %s3711_s4, [#allocation9]  }
 0x86c   :  { %3206 = dma.done.wait [#allocation4], 256  }
 0x86d   :  { %3207 = vsyncadd [#allocation4], 4294967040 }
 0x86e   :  { %3208 = dma.done.wait [#allocation9], 64  }
 0x86f   :  { %3209 = vsyncadd [#allocation9], 4294967232 }
 0x870   :  { %2661 = vsyncpa [#allocation3], 1 }
 0x871   :  { %2662 = vsyncpa [#allocation6], 1 }
 0x872   :  { %2663 = vsyncpa [#allocation4], 1 }
 0x873   :  { %2664 = vsyncpa [#allocation9], 1 }

</bundles_post_ra>
